<compile_context>
chip_gen: v7x
topology: tpu7x:2x2x1
jax: 0.10.0
libtpu: 0.0.40
codegen_flags: <defaults>
</compile_context>

<pallas_src>
import jax
import jax.numpy as jnp
import numpy as np
from jax.experimental import pallas as pl
from jax.experimental.pallas import tpu as pltpu


def _round_up(x, m):
    return ((x + m - 1) // m) * m


# ----------------------------------------------------------------------------
# Fused multi-layer kernel: (matmul + bias + ReLU) x n_stages, all in VMEM.
# ----------------------------------------------------------------------------
def _make_fused_kernel(n_stages):
    """Kernel body for an n_stages-layer fused MLP.

    Ref layout (variadic): x, (w_0, b_0), ..., (w_{S-1}, b_{S-1}), out.
    Matmul operands are bf16 (single-pass MXU, half the DMA bytes); the
    accumulation, bias-add and ReLU are f32.  Dropout = identity (eval).
    """
    def kernel(*refs):
        o_ref = refs[-1]
        h = refs[0][...]                              # bf16 activation tile
        for s in range(n_stages):                     # static unroll, S tiny
            w_ref = refs[1 + 2 * s]
            b_ref = refs[2 + 2 * s]
            h = jnp.dot(h, w_ref[...], preferred_element_type=jnp.float32)
            h = jnp.maximum(h + b_ref[...], 0.0)      # bias + ReLU in f32
            if s + 1 < n_stages:
                h = h.astype(jnp.bfloat16)            # bf16 operand for next pass
        o_ref[...] = h.astype(o_ref.dtype)
    return kernel


# ----------------------------------------------------------------------------
# VMEM budgeting and batch-tile selection.
# ----------------------------------------------------------------------------
def _vmem_budget_bytes():
    """Generation-aware scoped-VMEM budget with headroom below physical VMEM:
    v7x (64 MiB physical) -> ~52 MiB; v5e/v6e (128 MiB) -> ~104 MiB."""
    phys = 128 << 20
    try:
        phys = int(pltpu.get_tpu_info().vmem_capacity_bytes)
    except Exception:
        try:
            kind = jax.devices()[0].device_kind.lower()
            if "v7" in kind or "7x" in kind:
                phys = 64 << 20
        except Exception:
            pass
    if phys <= (64 << 20):
        return 52 << 20
    return 104 << 20


def _est_vmem_bytes(tile_b, stage_shapes):
    """Estimate in-kernel VMEM: double-buffered bf16 input / f32 output tiles,
    double-buffered grid-invariant bf16 weights + f32 biases, and the live f32
    intermediates kept by the unrolled layer loop."""
    w_bytes = sum(2 * (ip * op * 2 + op * 4) for ip, op in stage_shapes)
    in0, outl = stage_shapes[0][0], stage_shapes[-1][1]
    act = 2 * tile_b * in0 * 2 + 2 * tile_b * outl * 4
    widest = max(max(ip, op) for ip, op in stage_shapes)
    inter = 3 * tile_b * widest * 4
    return w_bytes + act + inter + (2 << 20)          # + compiler scratch headroom


def _choose_tile_b(batch, stage_shapes, budget):
    """Largest MXU-friendly batch tile (multiple of 16 for bf16 sublane
    packing) that fits the VMEM budget; ensure >= 2 grid steps when the batch
    allows it so both v7x TensorCores get work."""
    tile_b = 16
    for cand in (1024, 768, 512, 384, 256, 128, 64, 32, 16):
        if _est_vmem_bytes(cand, stage_shapes) <= budget:
            tile_b = cand
            break
    tile_b = min(tile_b, _round_up(batch, 16))        # don't over-pad tiny batches
    tile_b = max(16, (tile_b // 16) * 16)
    if _round_up(batch, tile_b) == tile_b and tile_b >= 256:
        tile_b = max(128, ((tile_b // 2) // 16) * 16)  # give the 2nd TC work
    return tile_b


# ----------------------------------------------------------------------------
# pallas_call wrapper.
# ----------------------------------------------------------------------------
def fused_fclayers(x_pad, ws, bs, *, tile_b, vmem_limit):
    """x_pad: (B_pad, in_pad0) bf16; ws[s]: (in_pad_s, out_pad_s) bf16;
    bs[s]: (1, out_pad_s) f32.  Returns (B_pad, out_pad_last) f32."""
    b_pad, in_pad0 = x_pad.shape
    n_stages = len(ws)
    out_pad = ws[-1].shape[1]
    assert b_pad % tile_b == 0 and tile_b % 16 == 0
    assert in_pad0 % 128 == 0 and out_pad % 128 == 0

    in_specs = [pl.BlockSpec((tile_b, in_pad0), lambda i: (i, 0))]
    operands = [x_pad]
    for w, b in zip(ws, bs):
        # Grid-invariant weight/bias blocks (constant index_map): small after
        # rectangular bf16 packing, so default double-buffering is budgeted.
        in_specs.append(pl.BlockSpec(tuple(w.shape), lambda i: (0, 0)))
        in_specs.append(pl.BlockSpec(tuple(b.shape), lambda i: (0, 0)))
        operands += [w, b]

    return pl.pallas_call(
        _make_fused_kernel(n_stages),
        out_shape=jax.ShapeDtypeStruct((b_pad, out_pad), jnp.float32),
        grid_spec=pltpu.PrefetchScalarGridSpec(
            num_scalar_prefetch=0,
            grid=(b_pad // tile_b,),
            in_specs=in_specs,
            out_specs=pl.BlockSpec((tile_b, out_pad), lambda i: (i, 0)),
        ),
        compiler_params=pltpu.CompilerParams(
            dimension_semantics=("parallel",),   # batch tiles across TCs
            vmem_limit_bytes=int(vmem_limit),
        ),
    )(*operands)


# ----------------------------------------------------------------------------
# Parameter construction (mimics nn.Linear / nn.BatchNorm1d init + stats).
# ----------------------------------------------------------------------------
def make_fclayers_params(key, n_in, n_out, n_cat_list, n_layers, n_hidden,
                         inject_covariates=True):
    n_cat_clean = [c if c > 1 else 0 for c in (n_cat_list or [])]
    cat_dim = sum(n_cat_clean)
    layers_dim = [n_in] + (n_layers - 1) * [n_hidden] + [n_out]

    raw_layers = []
    for i, (d_in, d_out) in enumerate(zip(layers_dim[:-1], layers_dim[1:])):
        inject = (i == 0) or inject_covariates
        full_in = d_in + cat_dim * int(inject)
        key, kw, kb, kg, kbt, km, kv = jax.random.split(key, 7)
        bound = 1.0 / np.sqrt(full_in)
        w = jax.random.uniform(kw, (d_out, full_in), jnp.float32, -bound, bound)
        b = jax.random.uniform(kb, (d_out,), jnp.float32, -bound, bound)
        # Non-trivial BN params / running stats so the fold is exercised.
        gamma = jax.random.uniform(kg, (d_out,), jnp.float32, 0.5, 1.5)
        beta = 0.1 * jax.random.normal(kbt, (d_out,), jnp.float32)
        mean = 0.1 * jax.random.normal(km, (d_out,), jnp.float32)
        var = jax.random.uniform(kv, (d_out,), jnp.float32, 0.5, 1.5)
        raw_layers.append(dict(w=w, b=b, gamma=gamma, beta=beta, mean=mean,
                               var=var, d_in=d_in, d_out=d_out, inject=inject))
    return raw_layers, n_cat_clean, layers_dim, cat_dim


def pack_params(raw_layers, cat_dim, inject_covariates, eps=1e-3):
    """Fold BatchNorm (eval) into each Linear and pack per-layer rectangular,
    lane-dense (128-multiple) weight slabs.  Covariates are injected via the
    packed weight rows and carried to later layers through exact identity
    passthrough columns (ReLU-safe: one-hots are >= 0)."""
    n_layers = len(raw_layers)
    cov = cat_dim > 0
    ws32, bs32, shapes = [], [], []
    cov_in = cov                                  # layer 0 input carries one-hots
    for i, p in enumerate(raw_layers):
        d_in, d_out = p["d_in"], p["d_out"]
        last = (i == n_layers - 1)
        inject = cov and p["inject"]
        carry = cov and inject_covariates and not last
        in_pad = _round_up(max(d_in + cat_dim * int(cov_in), 128), 128)
        out_pad = _round_up(max(d_out + cat_dim * int(carry), 128), 128)

        w = np.asarray(p["w"], np.float64)
        b = np.asarray(p["b"], np.float64)
        scale = np.asarray(p["gamma"], np.float64) / np.sqrt(
            np.asarray(p["var"], np.float64) + eps)
        shift = np.asarray(p["beta"], np.float64) - np.asarray(p["mean"], np.float64) * scale
        w_fold = w * scale[:, None]               # BN folded into W
        b_fold = b * scale + shift

        wp = np.zeros((in_pad, out_pad), np.float64)
        bp = np.zeros((1, out_pad), np.float64)
        wp[:d_in, :d_out] = w_fold[:, :d_in].T
        if inject:
            wp[d_in:d_in + cat_dim, :d_out] = w_fold[:, d_in:d_in + cat_dim].T
        if carry:
            assert cov_in
            idx = np.arange(cat_dim)
            wp[d_in + idx, d_out + idx] = 1.0     # exact identity, exact in bf16
        bp[0, :d_out] = b_fold

        ws32.append(wp.astype(np.float32))
        bs32.append(bp.astype(np.float32))
        shapes.append((in_pad, out_pad))
        cov_in = carry
    return ws32, bs32, shapes


def pack_inputs(x, cat_list, n_cat_clean, in_pad0):
    """x in cols [0, n_in); one-hot covariates right after at [n_in, n_in+cat)."""
    cols = [jnp.asarray(x, jnp.float32)]
    for n_cat, cat in zip(n_cat_clean, cat_list):
        if n_cat > 1:
            idx = jnp.asarray(cat).reshape(-1).astype(jnp.int32)
            cols.append(jax.nn.one_hot(idx, n_cat, dtype=jnp.float32))
    xc = jnp.concatenate(cols, axis=-1) if len(cols) > 1 else cols[0]
    pad = in_pad0 - xc.shape[1]
    if pad:
        xc = jnp.pad(xc, ((0, 0), (0, pad)))
    return xc


def fclayers_forward(x, cat_list, n_cat_clean, ws32, bs32, shapes, n_out,
                     tile_b=None):
    """Full FCLayers forward (eval mode) via the fused Pallas kernel."""
    B = x.shape[0]
    in_pad0 = shapes[0][0]
    budget = _vmem_budget_bytes()
    if tile_b is None:
        tile_b = _choose_tile_b(B, shapes, budget)
    b_pad = _round_up(B, tile_b)

    x_pack = pack_inputs(x, cat_list, n_cat_clean, in_pad0)
    if b_pad != B:
        x_pack = jnp.pad(x_pack, ((0, b_pad - B), (0, 0)))
    x_pack = x_pack.astype(jnp.bfloat16)

    ws = [jnp.asarray(w, jnp.bfloat16) for w in ws32]
    bs = [jnp.asarray(b, jnp.float32) for b in bs32]

    out = fused_fclayers(x_pack, ws, bs, tile_b=tile_b, vmem_limit=budget)
    return out[:B, :n_out]


# ----------------------------------------------------------------------------
# References for correctness checking.
# ----------------------------------------------------------------------------
def jax_reference_folded(x_pack_bf16, ws_bf16, bs_f32, n_out, batch):
    """Identical-operand (bf16) pure-JAX evaluation -> tight kernel check."""
    h = x_pack_bf16
    for w, b in zip(ws_bf16, bs_f32):
        h = jnp.dot(h.astype(jnp.bfloat16), w, preferred_element_type=jnp.float32)
        h = jnp.maximum(h + b, 0.0)
    return h[:batch, :n_out]


def numpy_module_reference(raw_layers, n_cat_clean, x, cat_list, eps=1e-3):
    """float64 replica of the original PyTorch module semantics (eval)."""
    one_hots = []
    for n_cat, cat in zip(n_cat_clean, cat_list):
        if n_cat > 1:
            idx = np.asarray(cat).reshape(-1).astype(np.int64)
            one_hots.append(np.eye(n_cat, dtype=np.float64)[idx])
    h = np.asarray(x, np.float64)
    for p in raw_layers:
        if p["inject"] and one_hots:
            h = np.concatenate([h] + one_hots, axis=-1)
        h = h @ np.asarray(p["w"], np.float64).T + np.asarray(p["b"], np.float64)
        scale = np.asarray(p["gamma"], np.float64) / np.sqrt(
            np.asarray(p["var"], np.float64) + eps)
        h = (h - np.asarray(p["mean"], np.float64)) * scale + np.asarray(
            p["beta"], np.float64)
        h = np.maximum(h, 0.0)          # ReLU; Dropout identity in eval
    return h


def numpy_folded_reference(x, cat_list, n_cat_clean, ws32, bs32, n_out):
    """float64 evaluation of the folded/packed math (checks fold + layout)."""
    x = np.asarray(x, np.float64)
    cols = [x]
    for n_cat, cat in zip(n_cat_clean, cat_list):
        if n_cat > 1:
            idx = np.asarray(cat).reshape(-1).astype(np.int64)
            cols.append(np.eye(n_cat, dtype=np.float64)[idx])
    h = np.concatenate(cols, axis=-1)
    h = np.pad(h, ((0, 0), (0, ws32[0].shape[0] - h.shape[1])))
    for w, b in zip(ws32, bs32):
        h = np.maximum(h @ np.asarray(w, np.float64) + np.asarray(b, np.float64)[0], 0.0)
    return h[:, :n_out]


# ----------------------------------------------------------------------------
if __name__ == "__main__":
    n_in, n_out = 32, 16
    n_hidden = 128            # module default
    n_layers = 3
    n_cat_list = [3, 2]
    eps = 1e-3

    key = jax.random.PRNGKey(0)
    kp, kd = jax.random.split(key)
    raw_layers, n_cat_clean, layers_dim, cat_dim = make_fclayers_params(
        kp, n_in, n_out, n_cat_list, n_layers, n_hidden, inject_covariates=True)
    ws32, bs32, shapes = pack_params(raw_layers, cat_dim,
                                     inject_covariates=True, eps=eps)

    # batch=512 exercises the large-tile, multi-step "parallel" grid (2 x 256
    # row tiles -> both v7x TensorCores); batch=37 exercises ragged padding.
    for batch in (512, 37):
        kb = jax.random.fold_in(kd, batch)
        kx, kc0, kc1 = jax.random.split(kb, 3)
        x = jax.random.normal(kx, (batch, n_in), jnp.float32)
        cat0 = jax.random.randint(kc0, (batch, 1), 0, n_cat_list[0])
        cat1 = jax.random.randint(kc1, (batch, 1), 0, n_cat_list[1])
        cat_list = (cat0, cat1)

        out = fclayers_forward(x, cat_list, n_cat_clean, ws32, bs32, shapes, n_out)
        out = np.asarray(jax.block_until_ready(out))
        assert out.shape == (batch, n_out)

        # 1) fold/pad/passthrough is mathematically faithful to the module (f64).
        ref_module = numpy_module_reference(raw_layers, n_cat_clean, x, cat_list, eps)
        ref_fold64 = numpy_folded_reference(x, cat_list, n_cat_clean, ws32, bs32, n_out)
        np.testing.assert_allclose(ref_fold64, ref_module, rtol=1e-5, atol=1e-5)

        # 2) kernel matches an identical-operand (bf16) pure-JAX evaluation.
        x_bf = pack_inputs(x, cat_list, n_cat_clean, shapes[0][0]).astype(jnp.bfloat16)
        ws_bf = [jnp.asarray(w, jnp.bfloat16) for w in ws32]
        bs_f = [jnp.asarray(b, jnp.float32) for b in bs32]
        ref_jax = np.asarray(jax_reference_folded(x_bf, ws_bf, bs_f, n_out, batch))
        np.testing.assert_allclose(out, ref_jax, rtol=1e-3, atol=1e-3)

        # 3) end-to-end vs float64 module semantics (loose: absorbs bf16
        #    matmul operands on the MXU).
        np.testing.assert_allclose(out, ref_module, rtol=5e-2, atol=5e-2)

    print("KERNEL_OK")
</pallas_src>

<mosaic_0001>
module attributes {stable_mosaic.version = 11 : i64} {
  func.func @kernel(%arg0: i32, %arg1: memref<256x128xbf16, #tpu.memory_space<vmem>>, %arg2: memref<128x256xbf16, #tpu.memory_space<vmem>>, %arg3: memref<1x256xf32, #tpu.memory_space<vmem>>, %arg4: memref<256x256xbf16, #tpu.memory_space<vmem>>, %arg5: memref<1x256xf32, #tpu.memory_space<vmem>>, %arg6: memref<256x128xbf16, #tpu.memory_space<vmem>>, %arg7: memref<1x128xf32, #tpu.memory_space<vmem>>, %arg8: memref<256x128xf32, #tpu.memory_space<vmem>>) attributes {dimension_semantics = [#tpu.dimension_semantics<parallel>], iteration_bounds = array<i64: 2>, scalar_prefetch = 0 : i64, scratch_operands = 0 : i64, tpu.core_type = #tpu.core_type<tc>, window_params = [{transform_indices = @transform_0, window_bounds = array<i64: 256, 128>}, {pipeline_mode = #tpu.pipeline_mode<synchronous>, transform_indices = @transform_1, window_bounds = array<i64: 128, 256>}, {pipeline_mode = #tpu.pipeline_mode<synchronous>, transform_indices = @transform_2, window_bounds = array<i64: 1, 256>}, {pipeline_mode = #tpu.pipeline_mode<synchronous>, transform_indices = @transform_3, window_bounds = array<i64: 256, 256>}, {pipeline_mode = #tpu.pipeline_mode<synchronous>, transform_indices = @transform_4, window_bounds = array<i64: 1, 256>}, {pipeline_mode = #tpu.pipeline_mode<synchronous>, transform_indices = @transform_5, window_bounds = array<i64: 256, 128>}, {pipeline_mode = #tpu.pipeline_mode<synchronous>, transform_indices = @transform_6, window_bounds = array<i64: 1, 128>}, {transform_indices = @transform_7, window_bounds = array<i64: 256, 128>}]} {
    %c0 = arith.constant 0 : index
    %c0_0 = arith.constant 0 : index
    %0 = vector.load %arg1[%c0, %c0_0] : memref<256x128xbf16, #tpu.memory_space<vmem>>, vector<256x128xbf16>
    %c0_1 = arith.constant 0 : index
    %c0_2 = arith.constant 0 : index
    %1 = vector.load %arg2[%c0_1, %c0_2] : memref<128x256xbf16, #tpu.memory_space<vmem>>, vector<128x256xbf16>
    %cst = arith.constant dense<0.000000e+00> : vector<256x256xf32>
    %2 = tpu.matmul %0, %1, %cst {dimension_numbers = #tpu.dot_dimension_numbers<[1], [0], [0], [1], [0, 0, 1, 1], [], []>} : vector<256x128xbf16>, vector<128x256xbf16>, vector<256x256xf32> -> vector<256x256xf32>
    %c0_3 = arith.constant 0 : index
    %c0_4 = arith.constant 0 : index
    %3 = vector.load %arg3[%c0_3, %c0_4] : memref<1x256xf32, #tpu.memory_space<vmem>>, vector<1x256xf32>
    %4 = vector.broadcast %3 : vector<1x256xf32> to vector<256x256xf32>
    %5 = arith.addf %2, %4 : vector<256x256xf32>
    %cst_5 = arith.constant 0.000000e+00 : f32
    %6 = vector.broadcast %cst_5 : f32 to vector<256x256xf32>
    %7 = arith.maximumf %5, %6 : vector<256x256xf32>
    %8 = arith.truncf %7 : vector<256x256xf32> to vector<256x256xbf16>
    %c0_6 = arith.constant 0 : index
    %c0_7 = arith.constant 0 : index
    %9 = vector.load %arg4[%c0_6, %c0_7] : memref<256x256xbf16, #tpu.memory_space<vmem>>, vector<256x256xbf16>
    %cst_8 = arith.constant dense<0.000000e+00> : vector<256x256xf32>
    %10 = tpu.matmul %8, %9, %cst_8 {dimension_numbers = #tpu.dot_dimension_numbers<[1], [0], [0], [1], [0, 0, 1, 1], [], []>} : vector<256x256xbf16>, vector<256x256xbf16>, vector<256x256xf32> -> vector<256x256xf32>
    %c0_9 = arith.constant 0 : index
    %c0_10 = arith.constant 0 : index
    %11 = vector.load %arg5[%c0_9, %c0_10] : memref<1x256xf32, #tpu.memory_space<vmem>>, vector<1x256xf32>
    %12 = vector.broadcast %11 : vector<1x256xf32> to vector<256x256xf32>
    %13 = arith.addf %10, %12 : vector<256x256xf32>
    %cst_11 = arith.constant 0.000000e+00 : f32
    %14 = vector.broadcast %cst_11 : f32 to vector<256x256xf32>
    %15 = arith.maximumf %13, %14 : vector<256x256xf32>
    %16 = arith.truncf %15 : vector<256x256xf32> to vector<256x256xbf16>
    %c0_12 = arith.constant 0 : index
    %c0_13 = arith.constant 0 : index
    %17 = vector.load %arg6[%c0_12, %c0_13] : memref<256x128xbf16, #tpu.memory_space<vmem>>, vector<256x128xbf16>
    %cst_14 = arith.constant dense<0.000000e+00> : vector<256x128xf32>
    %18 = tpu.matmul %16, %17, %cst_14 {dimension_numbers = #tpu.dot_dimension_numbers<[1], [0], [0], [1], [0, 0, 1, 1], [], []>} : vector<256x256xbf16>, vector<256x128xbf16>, vector<256x128xf32> -> vector<256x128xf32>
    %c0_15 = arith.constant 0 : index
    %c0_16 = arith.constant 0 : index
    %19 = vector.load %arg7[%c0_15, %c0_16] : memref<1x128xf32, #tpu.memory_space<vmem>>, vector<1x128xf32>
    %20 = vector.broadcast %19 : vector<1x128xf32> to vector<256x128xf32>
    %21 = arith.addf %18, %20 : vector<256x128xf32>
    %cst_17 = arith.constant 0.000000e+00 : f32
    %22 = vector.broadcast %cst_17 : f32 to vector<256x128xf32>
    %23 = arith.maximumf %21, %22 : vector<256x128xf32>
    %c0_18 = arith.constant 0 : index
    %c0_19 = arith.constant 0 : index
    %24 = vector.load %arg8[%c0_18, %c0_19] : memref<256x128xf32, #tpu.memory_space<vmem>>, vector<256x128xf32>
    tpu.vector_store %arg8[%c0_18, %c0_19], %23 {strides = array<i32>} : memref<256x128xf32, #tpu.memory_space<vmem>>, vector<256x128xf32>,
    return
  }
  func.func @transform_0(%arg0: i32) -> (i32, i32) {
    %c0_i32 = arith.constant 0 : i32
    %c0_i32_0 = arith.constant 0 : i32
    return %arg0, %c0_i32 : i32, i32
  }
  func.func @transform_1(%arg0: i32) -> (i32, i32) {
    %c0_i32 = arith.constant 0 : i32
    %c0_i32_0 = arith.constant 0 : i32
    %c0_i32_1 = arith.constant 0 : i32
    return %c0_i32, %c0_i32_0 : i32, i32
  }
  func.func @transform_2(%arg0: i32) -> (i32, i32) {
    %c0_i32 = arith.constant 0 : i32
    %c0_i32_0 = arith.constant 0 : i32
    %c0_i32_1 = arith.constant 0 : i32
    return %c0_i32, %c0_i32_0 : i32, i32
  }
  func.func @transform_3(%arg0: i32) -> (i32, i32) {
    %c0_i32 = arith.constant 0 : i32
    %c0_i32_0 = arith.constant 0 : i32
    %c0_i32_1 = arith.constant 0 : i32
    return %c0_i32, %c0_i32_0 : i32, i32
  }
  func.func @transform_4(%arg0: i32) -> (i32, i32) {
    %c0_i32 = arith.constant 0 : i32
    %c0_i32_0 = arith.constant 0 : i32
    %c0_i32_1 = arith.constant 0 : i32
    return %c0_i32, %c0_i32_0 : i32, i32
  }
  func.func @transform_5(%arg0: i32) -> (i32, i32) {
    %c0_i32 = arith.constant 0 : i32
    %c0_i32_0 = arith.constant 0 : i32
    %c0_i32_1 = arith.constant 0 : i32
    return %c0_i32, %c0_i32_0 : i32, i32
  }
  func.func @transform_6(%arg0: i32) -> (i32, i32) {
    %c0_i32 = arith.constant 0 : i32
    %c0_i32_0 = arith.constant 0 : i32
    %c0_i32_1 = arith.constant 0 : i32
    return %c0_i32, %c0_i32_0 : i32, i32
  }
  func.func @transform_7(%arg0: i32) -> (i32, i32) {
    %c0_i32 = arith.constant 0 : i32
    %c0_i32_0 = arith.constant 0 : i32
    return %arg0, %c0_i32 : i32, i32
  }
}

</mosaic_0001>

<bundles_post_ra>
// kernel: tpu_custom_call.1
= control target key start
LH: loop header
LB: loop body
LE: loop exit
PB: predicated region body
PF: predicated region fallthrough
CT: control target
= control target key end

     0   :  { %s3310_s0 = inlined_call_operand.hbm [shape: bf16[512,128], index: 0, kind: input, shape index: {}]   ;;  %s3311_s1 = inlined_call_operand.hbm [shape: bf16[128,256], index: 1, kind: input, shape index: {}]   ;;  %s3312_s2 = inlined_call_operand.hbm [shape: f32[1,256], index: 2, kind: input, shape index: {}]   ;;  %s3313_s3 = inlined_call_operand.hbm [shape: bf16[256,256], index: 3, kind: input, shape index: {}]   ;;  %s3314_s4 = inlined_call_operand.hbm [shape: f32[1,256], index: 4, kind: input, shape index: {}]   ;;  %s3315_s5 = inlined_call_operand.hbm [shape: bf16[256,128], index: 5, kind: input, shape index: {}]   ;;  %s3316_s6 = inlined_call_operand.hbm [shape: f32[1,128], index: 6, kind: input, shape index: {}]   ;;  %s3317_s7 = inlined_call_operand.hbm [shape: f32[512,128], index: 7, kind: output, shape index: {}]  }
   0x1   :  { %3321 = sst [smem:[#allocation20_spill]] %s3311_s1 }
   0x2   :  { %12 = vsyncpa [#allocation3], 0 }
   0x3   :  { %14 = vsyncpa [#allocation3 + $0x1], 0 }
   0x4   :  { %15 = vsyncpa [#allocation6], 0 }
   0x5   :  { %16 = vsyncpa [#allocation9], 0 }
   0x6   :  { %17 = vsyncpa [#allocation12], 0 }
   0x7   :  { %18 = vsyncpa [#allocation4], 0 }
   0x8   :  { %20 = vsyncpa [#allocation4 + $0x1], 0  ;;  %s2691_s24 = smov 0   ;;  %s2693_s25 = smov 0  }
   0x9   :  { %s2695_s26 = smov 0   ;;  %s2697_s27 = smov 0  }
   0xa LB: > { %s2636_s28 = smov [#allocation5]   ;;  %s2712_s30 = sadd.s32 4294967295, %s2634_s27   ;;  %s2634_s27 = sphi %s2697_s27, %s3345_s27   ;;  %s2630_s26 = sphi %s2695_s26, %s3344_s26   ;;  %s2626_s25 = sphi %s2693_s25, %s3343_s25   ;;  %s2622_s24 = sphi %s2691_s24, %s3342_s24  }
   0xb   : > { %s221_s29 = sshll.u32 %s2636_s28, 4  ;;  %p1904_p0 = scmp.ge.s32.totalorder %s2634_s27, 1  ;;  %s2717_s29 = int_to_ptr.vmem [resolvable:$true] %s221_s29 }
   0xc   : > { %p3318_p1 = scmp.eq.s32.totalorder %s2712_s30, 0  ;;  %p209_p2 = scmp.lt.s32.totalorder %s2634_s27, 3 }
   0xd   : > { %s2637_s9 = smov [#allocation8]   ;;  %s2638_s12 = smov [#allocation11]  }
   0xe   : > { %p2719_p3 = pnand %p1904_p0, %p209_p2  ;;  %s245_s10 = sshll.u32 %s2637_s9, 4  ;;  %s2732_s10 = int_to_ptr.vmem [resolvable:$true] %s245_s10 }
   0xf   : > { %s269_s13 = sshll.u32 %s2638_s12, 4  ;;  %s3324_s1 = sld [smem:[#allocation20_spill]]  ;;  %s2734_s13 = int_to_ptr.vmem [resolvable:$true] %s269_s13 }
  0x10   : > { %s3322_s8 = scalar_select %p2719_p3, 1, 0 }
  0x11   : > { %p2168_p5 = pneg %p2719_p3 }
  0x13   : > { %p2728_p6 = pnand %p2168_p5, %p3318_p1 }
  0x15   : > { %s2358_s16 = scalar_lea.hbm %s3324_s1, 2048  ;;  %p2744_p8 = pneg %p2728_p6 }
  0x16   : > { %p2359_p7 = scmp.ne.s32.totalorder %s3324_s1, %s2358_s16  ;;  %p2365_p11 = scmp.lt.u32.totalorder %s2358_s16, %s3324_s1 }
  0x18   : > { %p2361_p9 = pnand %p2744_p8, %p2359_p7 }
  0x1a   : > { %p2362_p10 = pneg %p2361_p9 }
  0x1c   : > { %p2367_p12 = pnand %p2365_p11, %p2362_p10 }
  0x1e   : > { %2370 = shalt.err (!%p2367_p12)
}
  0x1f   : > { %s2371_s22 = scalar_lea.vmem %s2717_s29, 2048  ;;  %p2379_p5 = scmp.lt.s32.totalorder %s2717_s29, %s2717_s29 }
  0x20   : > { %p2372_p13 = scmp.ne.s32.totalorder %s2717_s29, %s2371_s22  ;;  %p2380_p4 = scmp.lt.s32.totalorder %s2371_s22, %s2371_s22 }
  0x22   : > { %p2374_p0 = pnand %p2372_p13, %p2744_p8  ;;  %p2381_p7 = por %p2380_p4, %p2379_p5 }
  0x24   : > { %p2375_p2 = pneg %p2374_p0 }
  0x26   : > { %p2382_p9 = pnand %p2381_p7, %p2375_p2 }
  0x28   : > { %2385 = shalt.err (!%p2382_p9)
}
  0x29   : > { %s2639_s23 = smov 128   ;;  %s2640_s28 = smov 8  }
  0x2a   : > { %2171 = dma.hbm_to_vmem [thread:$0]  (!%p2728_p6), %s3324_s1, 2048, %s2717_s29, [#allocation6], %s2639_s23, %s2639_s23, %s2640_s28  }
  0x2b   : > { %s2386_s16 = scalar_lea.hbm %s3313_s3, 4096 }
  0x2c   : > { %p2387_p4 = scmp.ne.s32.totalorder %s3313_s3, %s2386_s16  ;;  %p2393_p12 = scmp.lt.u32.totalorder %s2386_s16, %s3313_s3 }
  0x2e   : > { %p2389_p10 = pnand %p2387_p4, %p2744_p8 }
  0x30   : > { %p2390_p11 = pneg %p2389_p10 }
  0x32   : > { %p2395_p13 = pnand %p2393_p12, %p2390_p11 }
  0x34   : > { %2398 = shalt.err (!%p2395_p13)
}
  0x35   : > { %s2399_s29 = scalar_lea.vmem %s2732_s10, 4096  ;;  %p2407_p7 = scmp.lt.s32.totalorder %s2732_s10, %s2732_s10 }
  0x36   : > { %p2400_p0 = scmp.ne.s32.totalorder %s2732_s10, %s2399_s29  ;;  %p2408_p9 = scmp.lt.s32.totalorder %s2399_s29, %s2399_s29 }
  0x38   : > { %p2402_p2 = pnand %p2400_p0, %p2744_p8  ;;  %p2409_p4 = por %p2408_p9, %p2407_p7 }
  0x3a   : > { %p2403_p5 = pneg %p2402_p2 }
  0x3c   : > { %p2410_p10 = pnand %p2409_p4, %p2403_p5 }
  0x3e   : > { %2413 = shalt.err (!%p2410_p10)
}
  0x3f   : > { %2177 = dma.hbm_to_vmem [thread:$0]  (!%p2728_p6), %s3313_s3, 4096, %s2732_s10, [#allocation9], %s2639_s23, %s2639_s23, %s2640_s28  }
  0x40   : > { %s2414_s15 = scalar_lea.hbm %s3315_s5, 2048 }
  0x41   : > { %p2415_p11 = scmp.ne.s32.totalorder %s3315_s5, %s2414_s15  ;;  %p2421_p0 = scmp.lt.u32.totalorder %s2414_s15, %s3315_s5 }
  0x43   : > { %p2417_p12 = pnand %p2415_p11, %p2744_p8 }
  0x45   : > { %p2418_p13 = pneg %p2417_p12 }
  0x47   : > { %p2423_p2 = pnand %p2421_p0, %p2418_p13 }
  0x49   : > { %2426 = shalt.err (!%p2423_p2)
}
  0x4a   : > { %s2427_s10 = scalar_lea.vmem %s2734_s13, 2048  ;;  %p2435_p4 = scmp.lt.s32.totalorder %s2734_s13, %s2734_s13 }
  0x4b   : > { %p2428_p5 = scmp.ne.s32.totalorder %s2734_s13, %s2427_s10  ;;  %p2436_p10 = scmp.lt.s32.totalorder %s2427_s10, %s2427_s10 }
  0x4d   : > { %p2430_p7 = pnand %p2428_p5, %p2744_p8  ;;  %p2437_p11 = por %p2436_p10, %p2435_p4 }
  0x4f   : > { %p2431_p9 = pneg %p2430_p7 }
  0x51   : > { %p2438_p12 = pnand %p2437_p11, %p2431_p9 }
  0x53   : > { %2441 = shalt.err (!%p2438_p12)
}
  0x54   : > { %s2641_s23 = smov 64   ;;  %s2642_s28 = smov 4  }
  0x55   : > { %2183 = dma.hbm_to_vmem [thread:$0]  (!%p2728_p6), %s3315_s5, 2048, %s2734_s13, [#allocation12], %s2641_s23, %s2641_s23, %s2642_s28  }
  0x56   : > { %s2643_s22 = smov [#allocation7]   ;;  %s2644_s12 = smov [#allocation10]  }
  0x57   : > { %s235_s9 = sshll.u32 %s2643_s22, 4  ;;  %s259_s14 = sshll.u32 %s2644_s12, 4  ;;  %s236_s9 = int_to_ptr.vmem [resolvable:$true] %s235_s9  ;;  %s260_s14 = int_to_ptr.vmem [resolvable:$true] %s259_s14 }
  0x58   : > { %s2442_s17 = scalar_lea.hbm %s3312_s2, 32 }
  0x59   : > { %p2443_p13 = scmp.ne.s32.totalorder %s3312_s2, %s2442_s17  ;;  %p2449_p5 = scmp.lt.u32.totalorder %s2442_s17, %s3312_s2 }
  0x5b   : > { %p2445_p0 = pnand %p2443_p13, %p2744_p8 }
  0x5d   : > { %p2446_p2 = pneg %p2445_p0 }
  0x5f   : > { %p2451_p7 = pnand %p2449_p5, %p2446_p2 }
  0x61   : > { %2454 = shalt.err (!%p2451_p7)
}
  0x62   : > { %s2455_s13 = scalar_lea.vmem %s236_s9, 32  ;;  %p2463_p11 = scmp.lt.s32.totalorder %s236_s9, %s236_s9 }
  0x63   : > { %p2456_p9 = scmp.ne.s32.totalorder %s236_s9, %s2455_s13  ;;  %p2464_p12 = scmp.lt.s32.totalorder %s2455_s13, %s2455_s13 }
  0x65   : > { %p2458_p4 = pnand %p2456_p9, %p2744_p8  ;;  %p2465_p1 = por %p2464_p12, %p2463_p11 }
  0x67   : > { %p2459_p10 = pneg %p2458_p4 }
  0x69   : > { %p2466_p3 = pnand %p2465_p1, %p2459_p10 }
  0x6b   : > { %2469 = shalt.err (!%p2466_p3)
}
  0x6c   : > { %2174 = dma.hbm_to_vmem [thread:$0]  (!%p2728_p6), %s3312_s2, 32, %s236_s9, [#allocation6]  }
  0x6d   : > { %s2470_s12 = scalar_lea.hbm %s3314_s4, 32 }
  0x6e   : > { %p2471_p13 = scmp.ne.s32.totalorder %s3314_s4, %s2470_s12  ;;  %p2477_p3 = scmp.lt.u32.totalorder %s2470_s12, %s3314_s4 }
  0x70   : > { %p2473_p0 = pnand %p2471_p13, %p2744_p8 }
  0x72   : > { %p2474_p1 = pneg %p2473_p0 }
  0x74   : > { %p2479_p2 = pnand %p2477_p3, %p2474_p1 }
  0x76   : > { %2482 = shalt.err (!%p2479_p2)
}
  0x77   : > { %s2483_s20 = scalar_lea.vmem %s260_s14, 32  ;;  %p2491_p4 = scmp.lt.s32.totalorder %s260_s14, %s260_s14 }
  0x78   : > { %p2484_p5 = scmp.ne.s32.totalorder %s260_s14, %s2483_s20  ;;  %p2492_p10 = scmp.lt.s32.totalorder %s2483_s20, %s2483_s20 }
  0x7a   : > { %p2486_p7 = pnand %p2484_p5, %p2744_p8  ;;  %p2493_p11 = por %p2492_p10, %p2491_p4 }
  0x7c   : > { %p2487_p9 = pneg %p2486_p7 }
  0x7e   : > { %p2494_p12 = pnand %p2493_p11, %p2487_p9 }
  0x80   : > { %2497 = shalt.err (!%p2494_p12)
}
  0x81   : > { %2180 = dma.hbm_to_vmem [thread:$0]  (!%p2728_p6), %s3314_s4, 32, %s260_s14, [#allocation9]  }
  0x82   : > { %s2645_s13 = smov [#allocation13]   ;;  %s2498_s22 = scalar_lea.hbm %s3316_s6, 16 }
  0x83   : > { %s283_s21 = sshll.u32 %s2645_s13, 4  ;;  %p2499_p13 = scmp.ne.s32.totalorder %s3316_s6, %s2498_s22  ;;  %s284_s21 = int_to_ptr.vmem [resolvable:$true] %s283_s21 }
  0x84   : > { %p2505_p3 = scmp.lt.u32.totalorder %s2498_s22, %s3316_s6 }
  0x85   : > { %p2501_p0 = pnand %p2499_p13, %p2744_p8 }
  0x87   : > { %p2502_p1 = pneg %p2501_p0 }
  0x89   : > { %p2507_p2 = pnand %p2505_p3, %p2502_p1 }
  0x8b   : > { %2510 = shalt.err (!%p2507_p2)
}
  0x8c   : > { %s2511_s14 = scalar_lea.vmem %s284_s21, 16  ;;  %s2518_s18 = scalar_lea.vmem %s284_s21, 32 }
  0x8d   : > { %p2512_p5 = scmp.ne.s32.totalorder %s284_s21, %s2511_s14  ;;  %p2519_p4 = scmp.lt.s32.totalorder %s284_s21, %s284_s21 }
  0x8e   : > { %p2520_p10 = scmp.lt.s32.totalorder %s2518_s18, %s2511_s14 }
  0x8f   : > { %p2514_p7 = pnand %p2512_p5, %p2744_p8 }
  0x90   : > { %p2521_p11 = por %p2520_p10, %p2519_p4 }
  0x91   : > { %p2515_p9 = pneg %p2514_p7 }
  0x93   : > { %p2522_p12 = pnand %p2521_p11, %p2515_p9 }
  0x95   : > { %2525 = shalt.err (!%p2522_p12)
}
  0x96   : > { %2186 = dma.hbm_to_vmem [thread:$0]  (!%p2728_p6), %s3316_s6, 16, %s284_s21, [#allocation12]  }
  0x97   : > { %s1903_s19 = sadd.s32 4294967294, %s2634_s27   ;;  %s2870_s11 = sadd.s32 1, %s2634_s27  }
  0x98   : > { %s30_s10 = ssub.s32 %s2634_s27, %s2870_s11  ;;  %s33_s13 = sadd.s32 1, %s2630_s26 }
  0x99   : > { %p31_p8 = scmp.eq.s32.totalorder %s30_s10, 0  ;;  %p40_p13 = scmp.ne.s32.totalorder %s2630_s26, %s2626_s25 }
  0x9a   : > { %p41_p0 = scmp.eq.s32.totalorder %s2634_s27, 0  ;;  %p46_p1 = scmp.ne.s32.totalorder %s2626_s25, %s2622_s24 }
  0x9b   : > { %s2881_s29 = scalar_select %p31_p8, %s2630_s26, %s33_s13  }
  0x9c   : > { %p2883_p3 = por %p41_p0, %p40_p13  ;;  %p3327_p2 = scmp.eq.s32.totalorder %s2712_s30, 0 }
  0x9d   : > { %p196_p5 = scmp.eq.s32.totalorder %s2712_s30, 1  ;;  %p202_p7 = scmp.eq.s32.totalorder %s1903_s19, 1 }
  0x9e   : > { %p2889_p6 = por %p3327_p2, %p46_p1  ;;  %p2201_p9 = scmp.lt.s32.totalorder %s2634_s27, 2 }
  0x9f   : > { %s294_s22 = sand.u32 1, %s2630_s26   ;;  %p2896_p4 = por %p196_p5, %p40_p13 }
  0xa0   : > { %p2900_p10 = por %p202_p7, %p46_p1  ;;  %s1912_s16 = sshll.u32 %s294_s22, 7 }
  0xa1   : > { %s3329_s12 = scalar_select %p2896_p4, 1, 0 }
  0xa2   : > { %s3330_s15 = scalar_select %p2900_p10, 1, 0 }
  0xa3   : > { %s2010_s17 = sshll.u32 %s2634_s27, 11  ;;  %s298_s9 = scalar_lea.vmem [#allocation2], %s1912_s16 }
  0xa4   : > { %s2908_s20 = scalar_lea.hbm %s3310_s0, %s2010_s17  ;;  %s305_s19 = sshll.u32 %s298_s9, 4  ;;  %s2910_s19 = int_to_ptr.vmem [resolvable:$true] %s305_s19 }
  0xa5   : > { %p2914_p11 = pnand %p2201_p9, %p2883_p3  ;;  %s2918_s13 = scalar_lea.sflag [#allocation3], %s294_s22 }
  0xa6   : > { %s2526_s14 = scalar_lea.hbm %s2908_s20, 2048  ;;  %s2531_s1 = scalar_lea.hbm %s3310_s0, 4096 }
  0xa7   : > { %p2527_p12 = scmp.ne.s32.totalorder %s2908_s20, %s2526_s14  ;;  %p2528_p8 = pneg %p2914_p11 }
  0xa8   : > { %p2532_p1 = scmp.lt.u32.totalorder %s2908_s20, %s3310_s0  ;;  %p2533_p3 = scmp.lt.u32.totalorder %s2531_s1, %s2526_s14 }
  0xa9   : > { %p2529_p13 = pnand %p2528_p8, %p2527_p12  ;;  %p2535_p5 = scmp.lt.u32.totalorder %s2526_s14, %s2908_s20 }
  0xaa   : > { %p2534_p2 = por %p2533_p3, %p2532_p1 }
  0xab   : > { %p2530_p0 = pneg %p2529_p13 }
  0xac   : > { %p2536_p7 = por %p2535_p5, %p2534_p2 }
  0xae   : > { %p2537_p9 = pnand %p2536_p7, %p2530_p0 }
  0xb0   : > { %2540 = shalt.err (!%p2537_p9)
}
  0xb1   : > { %s2541_s22 = scalar_lea.vmem %s2910_s19, 2048  ;;  %s2646_s16 = smov [#allocation2]  }
  0xb2   : > { %p2542_p12 = scmp.ne.s32.totalorder %s2910_s19, %s2541_s22  ;;  %s2546_s17 = sshll.u32 %s2646_s16, 4  ;;  %s2547_s17 = int_to_ptr.vmem [resolvable:$false] %s2546_s17 }
  0xb3   : > { %s2548_s18 = scalar_lea.vmem %s2547_s17, 4096  ;;  %p2549_p4 = scmp.lt.s32.totalorder %s2910_s19, %s2547_s17 }
  0xb4   : > { %p2544_p13 = pnand %p2542_p12, %p2528_p8  ;;  %p2550_p1 = scmp.lt.s32.totalorder %s2548_s18, %s2541_s22 }
  0xb6   : > { %p2545_p10 = pneg %p2544_p13  ;;  %p2551_p3 = por %p2550_p1, %p2549_p4 }
  0xb8   : > { %p2552_p2 = pnand %p2551_p3, %p2545_p10 }
  0xba   : > { %2555 = shalt.err (!%p2552_p2)
}
  0xbb   : > { %2190 = dma.hbm_to_vmem [thread:$0]  (!%p2914_p11), %s2908_s20, 2048, %s2910_s19, %s2918_s13, %s2641_s23, %s2641_s23, %s2642_s28  }
  0xbc   : > { %p3332_p8 = scmp.ne.s32.totalorder %s3322_s8, 0 }
  0xbd   : > { %s2952_s14 = sand.u32 (!%p3332_p8), 1, %s2626_s25  }
  0xbe   : > { %317 = sbr.rel (%p3332_p8) target bundleno = 1042 (0x412), region = 48  ;;  %s1916_s1 = sshll.u32 (!%p3332_p8), %s2952_s14, 7 }
  0xbf   : > { %s320_s9 = scalar_lea.sflag (!%p3332_p8), [#allocation3], %s2952_s14  ;;  %s2956_s22 = scalar_lea.vmem (!%p3332_p8), [#allocation2], %s1916_s1 }
  0xc5   : > { %2601 = dma.done.wait (%p2889_p6), %s320_s9, 2048  }
  0xc6   : > { %2603 = vsyncadd (%p2889_p6), %s320_s9, 4294965248  ;;  %p3333_p4 = scmp.eq.s32.totalorder %s2712_s30, 0 }
  0xc8   : > { %2605 = dma.done.wait (%p3333_p4), [#allocation6], 2080   ;;  %p3334_p10 = pmov %p3333_p4 }
  0xc9   : > { %p3335_p11 = pmov %p3333_p4 }
  0xca   : > { %2607 = vsyncadd (%p3334_p10), [#allocation6], 4294965216 }
  0xcb   : > { %2609 = dma.done.wait (%p3335_p11), [#allocation9], 4128   ;;  %p3336_p0 = pmov %p3333_p4 }
  0xcd   : > { %2611 = vsyncadd (%p3336_p0), [#allocation9], 4294963168  ;;  %p3337_p5 = pmov %p3336_p0 }
  0xce   : > { %p3338_p7 = pmov %p3336_p0 }
  0xcf   : > { %2613 = dma.done.wait (%p3337_p5), [#allocation12], 2064  }
  0xd0   : > { %2615 = vsyncadd (%p3338_p7), [#allocation12], 4294965232  ;;  %v2647_v0 = vmov 0   ;;  %v2254_v1 = vld [vmem:[#allocation5 + $0x4] ss:$8 sps:$4 sm:$0xff]   ;;  %v2280_v28 = vld [vmem:[%s2956_s22 + $0x10] sm:$0xff]  }
  0xd1   : > { %649 = vmatprep.mubr.bf16.mxu0 %v2647_v0  ;;  %729 = vmatprep.mubr.bf16.mxu1 %v2647_v0  ;;  %v2256_v2 = vld [vmem:[#allocation5] ss:$8 sps:$4 sm:$0xff]   ;;  %v2257_v3 = vld [vmem:[#allocation5 + $0x14] ss:$8 sps:$4 sm:$0xff]   ;;  %v2259_v4 = vld [vmem:[#allocation5 + $0x10] ss:$8 sps:$4 sm:$0xff]  }
  0xd2   : > { %617 = vmatprep.subr.bf16.mxu0 %v2254_v1  ;;  %2124 = vmatprep.subr.bf16.mxu1 %v2254_v1  ;;  %v2260_v5 = vld [vmem:[#allocation5 + $0x24] ss:$8 sps:$4 sm:$0xff]   ;;  %v2262_v6 = vld [vmem:[#allocation5 + $0x20] ss:$8 sps:$4 sm:$0xff]   ;;  %v2263_v7 = vld [vmem:[#allocation5 + $0x34] ss:$8 sps:$4 sm:$0xff]  }
  0xd3   : > { %618 = vmatpush1.bf16.msra.mxu0 %v2256_v2  ;;  %2132 = vmatpush1.bf16.msra.mxu1 %v2256_v2  ;;  %v2265_v8 = vld [vmem:[#allocation5 + $0x30] ss:$8 sps:$4 sm:$0xff]   ;;  %v2266_v9 = vld [vmem:[#allocation5 + $0x44] ss:$8 sps:$4 sm:$0xff]   ;;  %v2268_v10 = vld [vmem:[#allocation5 + $0x40] ss:$8 sps:$4 sm:$0xff]   ;;  %v431_v2 = vlaneseq }
  0xd4   : > { %619 = vmatprep.subr.bf16.mxu0 %v2257_v3  ;;  %2125 = vmatprep.subr.bf16.mxu1 %v2257_v3  ;;  %v2269_v11 = vld [vmem:[#allocation5 + $0x54] ss:$8 sps:$4 sm:$0xff]   ;;  %v2271_v12 = vld [vmem:[#allocation5 + $0x50] ss:$8 sps:$4 sm:$0xff]   ;;  %v2272_v13 = vld [vmem:[#allocation5 + $0x64] ss:$8 sps:$4 sm:$0xff]  }
  0xd5   : > { %v2274_v14 = vld [vmem:[#allocation5 + $0x60] ss:$8 sps:$4 sm:$0xff]   ;;  %v2275_v15 = vld [vmem:[#allocation5 + $0x74] ss:$8 sps:$4 sm:$0xff]   ;;  %v2277_v16 = vld [vmem:[#allocation5 + $0x70] ss:$8 sps:$4 sm:$0xff]  }
  0xd6   : > { %v2296_v17 = vld [vmem:[#allocation8 + $0x4] ss:$8 sps:$4 sm:$0xff]   ;;  %v2294_v20 = vld [vmem:[#allocation8] ss:$8 sps:$4 sm:$0xff]   ;;  %v2299_v21 = vld [vmem:[#allocation8 + $0x14] ss:$8 sps:$4 sm:$0xff]  }
  0xd7   : > { %620 = vmatpush1.bf16.msra.mxu0 %v2259_v4  ;;  %2133 = vmatpush1.bf16.msra.mxu1 %v2259_v4  ;;  %v2278_v18 = vld [vmem:[%s2956_s22] sm:$0xff]   ;;  %v2297_v22 = vld [vmem:[#allocation8 + $0x10] ss:$8 sps:$4 sm:$0xff]   ;;  %v2279_v24 = vld [vmem:[%s2956_s22 + $0x8] sm:$0xff]   ;;  %v3006_v3 = vshrl.u32 %v431_v2, 7  ;;  %s1923_s8 = sshll.u32 %s2952_s14, 8 }
  0xd8   : > { %621 = vmatprep.subr.bf16.mxu0 %v2260_v5  ;;  %2126 = vmatprep.subr.bf16.mxu1 %v2260_v5  ;;  %v2286_v19 = vld [vmem:[%s2956_s22 + $0x40] sm:$0xff]   ;;  %v2287_v25 = vld [vmem:[%s2956_s22 + $0x48] sm:$0xff]   ;;  %v2303_v29 = vld [vmem:[#allocation8 + $0x30] ss:$8 sps:$4 sm:$0xff]   ;;  %s3195_s23 = scalar_lea.vmem [#allocation14], %s1923_s8  ;;  %s2011_s28 = sshll.u32 %s2712_s30, 12 }
  0xd9   : > { %v2302_v23 = vld [vmem:[#allocation8 + $0x24] ss:$8 sps:$4 sm:$0xff]   ;;  %v2300_v26 = vld [vmem:[#allocation8 + $0x20] ss:$8 sps:$4 sm:$0xff]   ;;  %v2305_v27 = vld [vmem:[#allocation8 + $0x34] ss:$8 sps:$4 sm:$0xff]   ;;  %s3262_s10 = scalar_lea.hbm %s3317_s7, %s2011_s28 }
  0xda   : > { %v2288_v30 = vld [vmem:[%s2956_s22 + $0x50] sm:$0xff]   ;;  %v2306_v32 = vld [vmem:[#allocation8 + $0x40] ss:$8 sps:$4 sm:$0xff]   ;;  %v2281_v36 = vld [vmem:[%s2956_s22 + $0x18] sm:$0xff]   ;;  %v437_v5 = vsub.s32 1, %v3006_v3  ;;  %s1773_s21 = sshll.u32 %s3195_s23, 4  ;;  %s3264_s21 = int_to_ptr.vmem [resolvable:$true] %s1773_s21 }
  0xdb   : > { %622 = vmatpush1.bf16.msra.mxu0 %v2262_v6  ;;  %2134 = vmatpush1.bf16.msra.mxu1 %v2262_v6  ;;  %v2308_v31 = vld [vmem:[#allocation8 + $0x44] ss:$8 sps:$4 sm:$0xff]   ;;  %v2311_v33 = vld [vmem:[#allocation8 + $0x54] ss:$8 sps:$4 sm:$0xff]   ;;  %v2309_v34 = vld [vmem:[#allocation8 + $0x50] ss:$8 sps:$4 sm:$0xff]  }
  0xdc   : > { %623 = vmatprep.subr.bf16.mxu0 %v2263_v7  ;;  %2127 = vmatprep.subr.bf16.mxu1 %v2263_v7  ;;  %v2314_v35 = vld [vmem:[#allocation8 + $0x64] ss:$8 sps:$4 sm:$0xff]   ;;  %v2289_v37 = vld [vmem:[%s2956_s22 + $0x58] sm:$0xff]   ;;  %v2312_v38 = vld [vmem:[#allocation8 + $0x60] ss:$8 sps:$4 sm:$0xff]   ;;  %s1760_s13 = scalar_lea.sflag [#allocation4], %s2952_s14 }
  0xdd   : > { %v2317_v39 = vld [vmem:[#allocation8 + $0x74] ss:$8 sps:$4 sm:$0xff]   ;;  %v2315_v40 = vld [vmem:[#allocation8 + $0x70] ss:$8 sps:$4 sm:$0xff]   ;;  %v2320_v41 = vld [vmem:[#allocation8 + $0x84] ss:$8 sps:$4 sm:$0xff]  }
  0xde   : > { %v2282_v42 = vld [vmem:[%s2956_s22 + $0x20] sm:$0xff]   ;;  %v2321_v46 = vld [vmem:[#allocation8 + $0x90] ss:$8 sps:$4 sm:$0xff]   ;;  %v2283_v48 = vld [vmem:[%s2956_s22 + $0x28] sm:$0xff]   ;;  %s2556_s16 = scalar_lea.vmem %s3264_s21, 4096  ;;  %p3339_p9 = scmp.ne.s32.totalorder %s3329_s12, 0 }
  0xdf   : > { %624 = vmatpush1.bf16.msra.mxu0 %v2265_v8  ;;  %2135 = vmatpush1.bf16.msra.mxu1 %v2265_v8  ;;  %v2290_v43 = vld [vmem:[%s2956_s22 + $0x60] sm:$0xff]   ;;  %v2291_v49 = vld [vmem:[%s2956_s22 + $0x68] sm:$0xff]   ;;  %v2327_v52 = vld [vmem:[#allocation8 + $0xb0] ss:$8 sps:$4 sm:$0xff]   ;;  %p2557_p6 = scmp.ne.s32.totalorder %s3264_s21, %s2556_s16  ;;  %s2648_s30 = smov [#allocation14]  }
  0xe0   : > { %625 = vmatprep.subr.bf16.mxu0 %v2266_v9  ;;  %2128 = vmatprep.subr.bf16.mxu1 %v2266_v9  ;;  %v2318_v44 = vld [vmem:[#allocation8 + $0x80] ss:$8 sps:$4 sm:$0xff]   ;;  %v2323_v45 = vld [vmem:[#allocation8 + $0x94] ss:$8 sps:$4 sm:$0xff]   ;;  %v2326_v47 = vld [vmem:[#allocation8 + $0xa4] ss:$8 sps:$4 sm:$0xff]  }
  0xe1   : > { %v2324_v50 = vld [vmem:[#allocation8 + $0xa0] ss:$8 sps:$4 sm:$0xff]   ;;  %v2329_v51 = vld [vmem:[#allocation8 + $0xb4] ss:$8 sps:$4 sm:$0xff]   ;;  %v2332_v53 = vld [vmem:[#allocation8 + $0xc4] ss:$8 sps:$4 sm:$0xff]   ;;  %p2558_p12 = pnand %p2557_p6, %p3339_p9 }
  0xe2   : > { %v2284_v54 = vld [vmem:[%s2956_s22 + $0x30] sm:$0xff]   ;;  %v2330_v56 = vld [vmem:[#allocation8 + $0xc0] ss:$8 sps:$4 sm:$0xff]   ;;  %v2285_v59 = vld [vmem:[%s2956_s22 + $0x38] sm:$0xff]   ;;  %s2560_s17 = sshll.u32 %s2648_s30, 4  ;;  %s2561_s17 = int_to_ptr.vmem [resolvable:$false] %s2560_s17 }
  0xe3   : > { %626 = vmatpush1.bf16.msra.mxu0 %v2268_v10  ;;  %2136 = vmatpush1.bf16.msra.mxu1 %v2268_v10  ;;  %v2292_v55 = vld [vmem:[%s2956_s22 + $0x70] sm:$0xff]   ;;  %v2293_v60 = vld [vmem:[%s2956_s22 + $0x78] sm:$0xff]   ;;  %v2336_v62 = vld [vmem:[#allocation8 + $0xe0] ss:$8 sps:$4 sm:$0xff]   ;;  %p2559_p13 = pneg %p2558_p12  ;;  %s2562_s18 = scalar_lea.vmem %s2561_s17, 8192 }
  0xe4   : > { %627 = vmatprep.subr.bf16.mxu0 %v2269_v11  ;;  %2129 = vmatprep.subr.bf16.mxu1 %v2269_v11  ;;  %v2335_v57 = vld [vmem:[#allocation8 + $0xd4] ss:$8 sps:$4 sm:$0xff]   ;;  %v2333_v58 = vld [vmem:[#allocation8 + $0xd0] ss:$8 sps:$4 sm:$0xff]   ;;  %v2338_v61 = vld [vmem:[#allocation8 + $0xe4] ss:$8 sps:$4 sm:$0xff]   ;;  %p2563_p1 = scmp.lt.s32.totalorder %s3264_s21, %s2561_s17  ;;  %p2564_p3 = scmp.lt.s32.totalorder %s2562_s18, %s2556_s16 }
  0xe5   : > { %v2341_v63 = vld [vmem:[#allocation8 + $0xf4] ss:$8 sps:$4 sm:$0xff]   ;;  %v2339_v1 = vld [vmem:[#allocation8 + $0xf0] ss:$8 sps:$4 sm:$0xff]  }
  0xe6   : > { %v429_v4 = vld [vmem:[#allocation7] sm:$0x3]  ;;  %p2565_p2 = por %p2564_p3, %p2563_p1 }
  0xe7   : > { %628 = vmatpush1.bf16.msra.mxu0 %v2271_v12  ;;  %2137 = vmatpush1.bf16.msra.mxu1 %v2271_v12  ;;  %v3016_v7 = vrot.slane %v429_v4, %v437_v5 }
  0xe8   : > { %629 = vmatprep.subr.bf16.mxu0 %v2272_v13  ;;  %2130 = vmatprep.subr.bf16.mxu1 %v2272_v13  ;;  %p2566_p8 = pnand %p2565_p2, %p2559_p13 }
  0xeb   : > { %630 = vmatpush1.bf16.msra.mxu0 %v2274_v14  ;;  %2138 = vmatpush1.bf16.msra.mxu1 %v2274_v14 }
  0xec   : > { %631 = vmatprep.subr.bf16.mxu0 %v2275_v15  ;;  %2131 = vmatprep.subr.bf16.mxu1 %v2275_v15 }
  0xef   : > { %632 = vmatpush1.bf16.msra.mxu0 %v2277_v16  ;;  %2139 = vmatpush1.bf16.msra.mxu1 %v2277_v16 }
  0xf0   : > { %1110 = vmatprep.subr.bf16.mxu1 %v2296_v17 }
  0xf2   : > { %650 = vmatmul.mubr.bf16.vlgmr.msra.gmra.mrb[0].mxu0 %v2278_v18  ;;  %730 = vmatmul.mubr.bf16.vlgmr.msra.gmra.mrb[0].mxu1 %v2286_v19 }
  0xf3   : > { %659 = vmatprep.mubr.bf16.mxu0 %v2647_v0  ;;  %739 = vmatprep.mubr.bf16.mxu1 %v2647_v0 }
  0xf4   : > { %1111 = vmatpush1.bf16.msra.mxu1 %v2294_v20 }
  0xf5   : > { %1112 = vmatprep.subr.bf16.mxu1 %v2299_v21 }
  0xf8   : > { %1113 = vmatpush1.bf16.msra.mxu1 %v2297_v22 }
  0xf9   : > { %1114 = vmatprep.subr.bf16.mxu1 %v2302_v23  ;;  %v2342_v23 = vld [vmem:[#allocation11 + $0x40] sm:$0xff]  }
  0xfa   : > { %660 = vmatmul.mubr.bf16.gmra.mrb[4].mxu0 %v2279_v24  ;;  %740 = vmatmul.mubr.bf16.gmra.mrb[4].mxu1 %v2287_v25  ;;  %v2343_v24 = vld [vmem:[#allocation11] sm:$0xff]  }
  0xfb   : > { %669 = vmatprep.mubr.bf16.mxu0 %v2647_v0  ;;  %749 = vmatprep.mubr.bf16.mxu1 %v2647_v0 }
  0xfc   : > { %1115 = vmatpush1.bf16.msra.mxu1 %v2300_v26  ;;  %2012 = vmatprep.subr.bf16.mxu0 %v2342_v23 }
  0xfd   : > { %1116 = vmatprep.subr.bf16.mxu1 %v2305_v27  ;;  %2013 = vmatpush3.bf16.msra.mxu0 %v2343_v24  ;;  %v2351_v24 = vld [vmem:[#allocation11 + $0x20] sm:$0xff]  }
 0x100   : > { %1117 = vmatpush1.bf16.msra.mxu1 %v2303_v29 }
 0x101   : > { %1118 = vmatprep.subr.bf16.mxu1 %v2308_v31 }
 0x102   : > { %670 = vmatmul.mubr.bf16.gmra.mrb[8].mxu0 %v2280_v28  ;;  %750 = vmatmul.mubr.bf16.gmra.mrb[8].mxu1 %v2288_v30  ;;  %v2344_v28 = vld [vmem:[#allocation11 + $0x48] sm:$0xff]  }
 0x103   : > { %679 = vmatprep.mubr.bf16.mxu0 %v2647_v0  ;;  %759 = vmatprep.mubr.bf16.mxu1 %v2647_v0 }
 0x104   : > { %1119 = vmatpush1.bf16.msra.mxu1 %v2306_v32  ;;  %2014 = vmatprep.subr.bf16.mxu0 %v2344_v28 }
 0x105   : > { %1120 = vmatprep.subr.bf16.mxu1 %v2311_v33 }
 0x108   : > { %1121 = vmatpush1.bf16.msra.mxu1 %v2309_v34 }
 0x109   : > { %1122 = vmatprep.subr.bf16.mxu1 %v2314_v35  ;;  %v2345_v35 = vld [vmem:[#allocation11 + $0x8] sm:$0xff]  }
 0x10a   : > { %680 = vmatmul.mubr.bf16.gmra.mrb[12].mxu0 %v2281_v36  ;;  %760 = vmatmul.mubr.bf16.gmra.mrb[12].mxu1 %v2289_v37 }
 0x10b   : > { %689 = vmatprep.mubr.bf16.mxu0 %v2647_v0  ;;  %769 = vmatprep.mubr.bf16.mxu1 %v2647_v0 }
 0x10c   : > { %1123 = vmatpush1.bf16.msra.mxu1 %v2312_v38  ;;  %v2346_v38 = vld [vmem:[#allocation11 + $0x50] sm:$0xff]   ;;  %2015 = vmatpush3.bf16.msra.mxu0 %v2345_v35 }
 0x10d   : > { %1124 = vmatprep.subr.bf16.mxu1 %v2317_v39  ;;  %2016 = vmatprep.subr.bf16.mxu0 %v2346_v38 }
 0x110   : > { %1125 = vmatpush1.bf16.msra.mxu1 %v2315_v40 }
 0x111   : > { %1126 = vmatprep.subr.bf16.mxu1 %v2320_v41 }
 0x112   : > { %690 = vmatmul.mubr.bf16.gmra.mrb[16].mxu0 %v2282_v42  ;;  %770 = vmatmul.mubr.bf16.gmra.mrb[16].mxu1 %v2290_v43 }
 0x113   : > { %699 = vmatprep.mubr.bf16.mxu0 %v2647_v0  ;;  %779 = vmatprep.mubr.bf16.mxu1 %v2647_v0 }
 0x114   : > { %1127 = vmatpush1.bf16.msra.mxu1 %v2318_v44 }
 0x115   : > { %1128 = vmatprep.subr.bf16.mxu1 %v2323_v45 }
 0x118   : > { %1129 = vmatpush1.bf16.msra.mxu1 %v2321_v46 }
 0x119   : > { %1130 = vmatprep.subr.bf16.mxu1 %v2326_v47 }
 0x11a   : > { %700 = vmatmul.mubr.bf16.gmra.mrb[20].mxu0 %v2283_v48  ;;  %780 = vmatmul.mubr.bf16.gmra.mrb[20].mxu1 %v2291_v49 }
 0x11b   : > { %709 = vmatprep.mubr.bf16.mxu0 %v2647_v0  ;;  %789 = vmatprep.mubr.bf16.mxu1 %v2647_v0 }
 0x11c   : > { %1131 = vmatpush1.bf16.msra.mxu1 %v2324_v50 }
 0x11d   : > { %1132 = vmatprep.subr.bf16.mxu1 %v2329_v51  ;;  %v2347_v51 = vld [vmem:[#allocation11 + $0x10] sm:$0xff]  }
 0x11e   : > { %2017 = vmatpush3.bf16.msra.mxu0 %v2347_v51 }
 0x120   : > { %1133 = vmatpush1.bf16.msra.mxu1 %v2327_v52 }
 0x121   : > { %1134 = vmatprep.subr.bf16.mxu1 %v2332_v53 }
 0x122   : > { %710 = vmatmul.mubr.bf16.gmra.mrb[24].mxu0 %v2284_v54  ;;  %790 = vmatmul.mubr.bf16.gmra.mrb[24].mxu1 %v2292_v55 }
 0x123   : > { %719 = vmatprep.mubr.bf16.mxu0 %v2647_v0  ;;  %799 = vmatprep.mubr.bf16.mxu1 %v2647_v0  ;;  %v433_v0 = vsub.s32 0, %v3006_v3 }
 0x124   : > { %1135 = vmatpush1.bf16.msra.mxu1 %v2330_v56 }
 0x125   : > { %1136 = vmatprep.subr.bf16.mxu1 %v2335_v57  ;;  %v3012_v6 = vrot.slane %v429_v4, %v433_v0  ;;  %v2348_v57 = vld [vmem:[#allocation11 + $0x58] sm:$0xff]  }
 0x126   : > { %2018 = vmatprep.subr.bf16.mxu0 %v2348_v57 }
 0x128   : > { %1137 = vmatpush1.bf16.msra.mxu1 %v2333_v58 }
 0x129   : > { %1138 = vmatprep.subr.bf16.mxu1 %v2338_v61 }
 0x12a   : > { %720 = vmatmul.mubr.bf16.gmra.mrb[28].mxu0 %v2285_v59  ;;  %800 = vmatmul.mubr.bf16.gmra.mrb[28].mxu1 %v2293_v60 }
 0x12c   : > { %1139 = vmatpush1.bf16.msra.mxu1 %v2336_v62 }
 0x12d   : > { %1140 = vmatprep.subr.bf16.mxu1 %v2341_v63 }
 0x130   : > { %1141 = vmatpush1.bf16.msra.mxu1 %v2339_v1 }
 0x1c5   : > { %v651_v8 = vpop.f32.mrb[0].mxu0  ;;  %v731_v9 = vpop.f32.mrb[0].mxu1 }
 0x1c6   : > { %v652_v10 = vadd.f32 %v651_v8, %v3012_v6  ;;  %v653_v11 = vpop.f32.mrb[1].mxu0  ;;  %v732_v12 = vadd.f32 %v731_v9, %v3012_v6  ;;  %v733_v13 = vpop.f32.mrb[1].mxu1  ;;  %v2349_v8 = vld [vmem:[#allocation11 + $0x18] sm:$0xff]  }
 0x1c7   : > { %v654_v14 = vadd.f32 %v653_v11, %v3016_v7  ;;  %v655_v15 = vpop.f32.mrb[2].mxu0  ;;  %v734_v16 = vadd.f32 %v733_v13, %v3016_v7  ;;  %v735_v17 = vpop.f32.mrb[2].mxu1  ;;  %v2350_v11 = vld [vmem:[#allocation11 + $0x60] sm:$0xff]   ;;  %2019 = vmatpush3.bf16.msra.mxu0 %v2349_v8 }
 0x1c8   : > { %v656_v18 = vadd.f32 %v655_v15, %v3012_v6  ;;  %v657_v19 = vpop.f32.mrb[3].mxu0  ;;  %v842_v20 = vmax.f32 %v732_v12, 0.0  ;;  %v736_v21 = vadd.f32 %v735_v17, %v3012_v6  ;;  %v737_v22 = vpop.f32.mrb[3].mxu1  ;;  %v810_v29 = vmax.f32 %v652_v10, 0.0  ;;  %2020 = vmatprep.subr.bf16.mxu0 %v2350_v11 }
 0x1c9   : > { %v658_v25 = vadd.f32 %v657_v19, %v3016_v7  ;;  %v843_v26 = vmax.f32 %v734_v16, 0.0  ;;  %v738_v27 = vadd.f32 %v737_v22, %v3016_v7  ;;  %v811_v32 = vmax.f32 %v654_v14, 0.0 }
 0x1ca   : > { %v812_v30 = vmax.f32 %v656_v18, 0.0  ;;  %v844_v31 = vmax.f32 %v736_v21, 0.0 }
 0x1cb   : > { %v813_v33 = vmax.f32 %v658_v25, 0.0  ;;  %v845_v34 = vmax.f32 %v738_v27, 0.0  ;;  %2021 = vmatpush3.bf16.msra.mxu0 %v2351_v24 }
 0x1cc   : > { %v874_v36 = vpack.c.bf16 %v812_v30, %v810_v29  ;;  %v3026_v37 = vpack.c.bf16 %v844_v31, %v842_v20  ;;  %v2352_v30 = vld [vmem:[#allocation11 + $0x68] sm:$0xff]  }
 0x1cd   : > { %v875_v39 = vpack.c.bf16 %v813_v33, %v811_v32  ;;  %v661_v40 = vpop.f32.mrb[4].mxu0  ;;  %v3028_v41 = vpack.c.bf16 %v845_v34, %v843_v26  ;;  %v741_v42 = vpop.f32.mrb[4].mxu1  ;;  %2022 = vmatprep.subr.bf16.mxu0 %v2352_v30 }
 0x1ce   : > { %v662_v43 = vadd.f32 %v661_v40, %v3012_v6  ;;  %v663_v44 = vpop.f32.mrb[5].mxu0  ;;  %v742_v45 = vadd.f32 %v741_v42, %v3012_v6  ;;  %v743_v46 = vpop.f32.mrb[5].mxu1  ;;  %v2353_v42 = vld [vmem:[#allocation11 + $0x28] sm:$0xff]  }
 0x1cf   : > { %v664_v47 = vadd.f32 %v663_v44, %v3016_v7  ;;  %v665_v48 = vpop.f32.mrb[6].mxu0  ;;  %1142 = vmatprep.mubr.bf16.mxu1 %v875_v39  ;;  %v744_v49 = vadd.f32 %v743_v46, %v3016_v7  ;;  %v745_v50 = vpop.f32.mrb[6].mxu1  ;;  %2023 = vmatpush3.bf16.msra.mxu0 %v2353_v42 }
 0x1d0   : > { %v666_v52 = vadd.f32 %v665_v48, %v3012_v6  ;;  %v667_v53 = vpop.f32.mrb[7].mxu0  ;;  %1143 = vmatmul.mubr.bf16.vlgmr.msra.gmra.mrb[32].mxu1 %v874_v36  ;;  %v846_v54 = vmax.f32 %v742_v45, 0.0  ;;  %v746_v55 = vadd.f32 %v745_v50, %v3012_v6  ;;  %v747_v56 = vpop.f32.mrb[7].mxu1  ;;  %v814_v61 = vmax.f32 %v662_v43, 0.0  ;;  %v2354_v45 = vld [vmem:[#allocation11 + $0x70] sm:$0xff]  }
 0x1d1   : > { %v668_v58 = vadd.f32 %v667_v53, %v3016_v7  ;;  %v847_v59 = vmax.f32 %v744_v49, 0.0  ;;  %v748_v60 = vadd.f32 %v747_v56, %v3016_v7  ;;  %v815_v1 = vmax.f32 %v664_v47, 0.0  ;;  %2024 = vmatprep.subr.bf16.mxu0 %v2354_v45 }
 0x1d2   : > { %v816_v62 = vmax.f32 %v666_v52, 0.0  ;;  %v848_v63 = vmax.f32 %v746_v55, 0.0 }
 0x1d3   : > { %v817_v2 = vmax.f32 %v668_v58, 0.0  ;;  %v849_v4 = vmax.f32 %v748_v60, 0.0  ;;  %v2355_v58 = vld [vmem:[#allocation11 + $0x30] sm:$0xff]  }
 0x1d4   : > { %v876_v9 = vpack.c.bf16 %v816_v62, %v814_v61  ;;  %v3038_v10 = vpack.c.bf16 %v848_v63, %v846_v54  ;;  %2025 = vmatpush3.bf16.msra.mxu0 %v2355_v58 }
 0x1d5   : > { %v877_v12 = vpack.c.bf16 %v817_v2, %v815_v1  ;;  %v671_v13 = vpop.f32.mrb[8].mxu0  ;;  %v3040_v14 = vpack.c.bf16 %v849_v4, %v847_v59  ;;  %v751_v15 = vpop.f32.mrb[8].mxu1 }
 0x1d6   : > { %v672_v16 = vadd.f32 %v671_v13, %v3012_v6  ;;  %v673_v17 = vpop.f32.mrb[9].mxu0  ;;  %v752_v18 = vadd.f32 %v751_v15, %v3012_v6  ;;  %v753_v19 = vpop.f32.mrb[9].mxu1 }
 0x1d7   : > { %v674_v20 = vadd.f32 %v673_v17, %v3016_v7  ;;  %v675_v21 = vpop.f32.mrb[10].mxu0  ;;  %1152 = vmatprep.mubr.bf16.mxu1 %v877_v12  ;;  %v754_v22 = vadd.f32 %v753_v19, %v3016_v7  ;;  %v755_v23 = vpop.f32.mrb[10].mxu1 }
 0x1d8   : > { %v676_v25 = vadd.f32 %v675_v21, %v3012_v6  ;;  %v677_v26 = vpop.f32.mrb[11].mxu0  ;;  %1153 = vmatmul.mubr.bf16.gmra.mrb[36].mxu1 %v876_v9  ;;  %v850_v27 = vmax.f32 %v752_v18, 0.0  ;;  %v756_v28 = vadd.f32 %v755_v23, %v3012_v6  ;;  %v757_v29 = vpop.f32.mrb[11].mxu1  ;;  %v818_v34 = vmax.f32 %v672_v16, 0.0 }
 0x1d9   : > { %v678_v31 = vadd.f32 %v677_v26, %v3016_v7  ;;  %v851_v32 = vmax.f32 %v754_v22, 0.0  ;;  %v758_v33 = vadd.f32 %v757_v29, %v3016_v7  ;;  %v819_v38 = vmax.f32 %v674_v20, 0.0 }
 0x1da   : > { %v820_v35 = vmax.f32 %v676_v25, 0.0  ;;  %v852_v36 = vmax.f32 %v756_v28, 0.0 }
 0x1db   : > { %v821_v39 = vmax.f32 %v678_v31, 0.0  ;;  %v853_v40 = vmax.f32 %v758_v33, 0.0 }
 0x1dc   : > { %v878_v43 = vpack.c.bf16 %v820_v35, %v818_v34  ;;  %v3050_v44 = vpack.c.bf16 %v852_v36, %v850_v27 }
 0x1dd   : > { %v879_v46 = vpack.c.bf16 %v821_v39, %v819_v38  ;;  %v681_v47 = vpop.f32.mrb[12].mxu0  ;;  %v3052_v48 = vpack.c.bf16 %v853_v40, %v851_v32  ;;  %v761_v49 = vpop.f32.mrb[12].mxu1 }
 0x1de   : > { %v682_v50 = vadd.f32 %v681_v47, %v3012_v6  ;;  %v683_v51 = vpop.f32.mrb[13].mxu0  ;;  %v762_v52 = vadd.f32 %v761_v49, %v3012_v6  ;;  %v763_v53 = vpop.f32.mrb[13].mxu1 }
 0x1df   : > { %v684_v54 = vadd.f32 %v683_v51, %v3016_v7  ;;  %v685_v55 = vpop.f32.mrb[14].mxu0  ;;  %1162 = vmatprep.mubr.bf16.mxu1 %v879_v46  ;;  %v764_v56 = vadd.f32 %v763_v53, %v3016_v7  ;;  %v765_v57 = vpop.f32.mrb[14].mxu1 }
 0x1e0   : > { %v686_v59 = vadd.f32 %v685_v55, %v3012_v6  ;;  %v687_v60 = vpop.f32.mrb[15].mxu0  ;;  %1163 = vmatmul.mubr.bf16.gmra.mrb[40].mxu1 %v878_v43  ;;  %v854_v61 = vmax.f32 %v762_v52, 0.0  ;;  %v766_v62 = vadd.f32 %v765_v57, %v3012_v6  ;;  %v767_v63 = vpop.f32.mrb[15].mxu1  ;;  %v822_v8 = vmax.f32 %v682_v50, 0.0 }
 0x1e1   : > { %v688_v1 = vadd.f32 %v687_v60, %v3016_v7  ;;  %v855_v2 = vmax.f32 %v764_v56, 0.0  ;;  %v768_v4 = vadd.f32 %v767_v63, %v3016_v7  ;;  %v823_v12 = vmax.f32 %v684_v54, 0.0 }
 0x1e2   : > { %v824_v9 = vmax.f32 %v686_v59, 0.0  ;;  %v856_v11 = vmax.f32 %v766_v62, 0.0 }
 0x1e3   : > { %v825_v13 = vmax.f32 %v688_v1, 0.0  ;;  %v857_v15 = vmax.f32 %v768_v4, 0.0 }
 0x1e4   : > { %v880_v16 = vpack.c.bf16 %v824_v9, %v822_v8  ;;  %v3062_v17 = vpack.c.bf16 %v856_v11, %v854_v61 }
 0x1e5   : > { %v881_v18 = vpack.c.bf16 %v825_v13, %v823_v12  ;;  %v691_v19 = vpop.f32.mrb[16].mxu0  ;;  %v3064_v20 = vpack.c.bf16 %v857_v15, %v855_v2  ;;  %v771_v21 = vpop.f32.mrb[16].mxu1 }
 0x1e6   : > { %v692_v22 = vadd.f32 %v691_v19, %v3012_v6  ;;  %v693_v23 = vpop.f32.mrb[17].mxu0  ;;  %v772_v24 = vadd.f32 %v771_v21, %v3012_v6  ;;  %v773_v25 = vpop.f32.mrb[17].mxu1 }
 0x1e7   : > { %v694_v26 = vadd.f32 %v693_v23, %v3016_v7  ;;  %v695_v27 = vpop.f32.mrb[18].mxu0  ;;  %1172 = vmatprep.mubr.bf16.mxu1 %v881_v18  ;;  %v774_v28 = vadd.f32 %v773_v25, %v3016_v7  ;;  %v775_v29 = vpop.f32.mrb[18].mxu1 }
 0x1e8   : > { %v696_v30 = vadd.f32 %v695_v27, %v3012_v6  ;;  %v697_v31 = vpop.f32.mrb[19].mxu0  ;;  %1173 = vmatmul.mubr.bf16.gmra.mrb[44].mxu1 %v880_v16  ;;  %v858_v32 = vmax.f32 %v772_v24, 0.0  ;;  %v776_v33 = vadd.f32 %v775_v29, %v3012_v6  ;;  %v777_v34 = vpop.f32.mrb[19].mxu1  ;;  %v826_v39 = vmax.f32 %v692_v22, 0.0 }
 0x1e9   : > { %v698_v35 = vadd.f32 %v697_v31, %v3016_v7  ;;  %v859_v36 = vmax.f32 %v774_v28, 0.0  ;;  %v778_v38 = vadd.f32 %v777_v34, %v3016_v7  ;;  %v827_v43 = vmax.f32 %v694_v26, 0.0 }
 0x1ea   : > { %v828_v40 = vmax.f32 %v696_v30, 0.0  ;;  %v860_v42 = vmax.f32 %v776_v33, 0.0 }
 0x1eb   : > { %v829_v45 = vmax.f32 %v698_v35, 0.0  ;;  %v861_v46 = vmax.f32 %v778_v38, 0.0 }
 0x1ec   : > { %v882_v47 = vpack.c.bf16 %v828_v40, %v826_v39  ;;  %v3074_v49 = vpack.c.bf16 %v860_v42, %v858_v32 }
 0x1ed   : > { %v883_v50 = vpack.c.bf16 %v829_v45, %v827_v43  ;;  %v701_v51 = vpop.f32.mrb[20].mxu0  ;;  %v3076_v52 = vpack.c.bf16 %v861_v46, %v859_v36  ;;  %v781_v53 = vpop.f32.mrb[20].mxu1 }
 0x1ee   : > { %v702_v54 = vadd.f32 %v701_v51, %v3012_v6  ;;  %v703_v55 = vpop.f32.mrb[21].mxu0  ;;  %v782_v56 = vadd.f32 %v781_v53, %v3012_v6  ;;  %v783_v57 = vpop.f32.mrb[21].mxu1 }
 0x1ef   : > { %v704_v58 = vadd.f32 %v703_v55, %v3016_v7  ;;  %v705_v59 = vpop.f32.mrb[22].mxu0  ;;  %1182 = vmatprep.mubr.bf16.mxu1 %v883_v50  ;;  %v784_v60 = vadd.f32 %v783_v57, %v3016_v7  ;;  %v785_v61 = vpop.f32.mrb[22].mxu1 }
 0x1f0   : > { %v706_v62 = vadd.f32 %v705_v59, %v3012_v6  ;;  %v707_v63 = vpop.f32.mrb[23].mxu0  ;;  %1183 = vmatmul.mubr.bf16.gmra.mrb[48].mxu1 %v882_v47  ;;  %v862_v1 = vmax.f32 %v782_v56, 0.0  ;;  %v786_v2 = vadd.f32 %v785_v61, %v3012_v6  ;;  %v787_v4 = vpop.f32.mrb[23].mxu1  ;;  %v830_v12 = vmax.f32 %v702_v54, 0.0 }
 0x1f1   : > { %v708_v8 = vadd.f32 %v707_v63, %v3016_v7  ;;  %v863_v9 = vmax.f32 %v784_v60, 0.0  ;;  %v788_v11 = vadd.f32 %v787_v4, %v3016_v7  ;;  %v831_v16 = vmax.f32 %v704_v58, 0.0 }
 0x1f2   : > { %v832_v13 = vmax.f32 %v706_v62, 0.0  ;;  %v864_v15 = vmax.f32 %v786_v2, 0.0 }
 0x1f3   : > { %v833_v18 = vmax.f32 %v708_v8, 0.0  ;;  %v865_v19 = vmax.f32 %v788_v11, 0.0 }
 0x1f4   : > { %v884_v21 = vpack.c.bf16 %v832_v13, %v830_v12  ;;  %v3086_v22 = vpack.c.bf16 %v864_v15, %v862_v1 }
 0x1f5   : > { %v885_v23 = vpack.c.bf16 %v833_v18, %v831_v16  ;;  %v711_v24 = vpop.f32.mrb[24].mxu0  ;;  %v3088_v25 = vpack.c.bf16 %v865_v19, %v863_v9  ;;  %v791_v26 = vpop.f32.mrb[24].mxu1 }
 0x1f6   : > { %v712_v27 = vadd.f32 %v711_v24, %v3012_v6  ;;  %v713_v28 = vpop.f32.mrb[25].mxu0  ;;  %v792_v29 = vadd.f32 %v791_v26, %v3012_v6  ;;  %v793_v30 = vpop.f32.mrb[25].mxu1 }
 0x1f7   : > { %v714_v31 = vadd.f32 %v713_v28, %v3016_v7  ;;  %v715_v32 = vpop.f32.mrb[26].mxu0  ;;  %1192 = vmatprep.mubr.bf16.mxu1 %v885_v23  ;;  %v794_v33 = vadd.f32 %v793_v30, %v3016_v7  ;;  %v795_v34 = vpop.f32.mrb[26].mxu1 }
 0x1f8   : > { %v716_v35 = vadd.f32 %v715_v32, %v3012_v6  ;;  %v717_v36 = vpop.f32.mrb[27].mxu0  ;;  %1193 = vmatmul.mubr.bf16.gmra.mrb[52].mxu1 %v884_v21  ;;  %v866_v38 = vmax.f32 %v792_v29, 0.0  ;;  %v796_v39 = vadd.f32 %v795_v34, %v3012_v6  ;;  %v797_v40 = vpop.f32.mrb[27].mxu1  ;;  %v834_v46 = vmax.f32 %v712_v27, 0.0 }
 0x1f9   : > { %v718_v42 = vadd.f32 %v717_v36, %v3016_v7  ;;  %v867_v43 = vmax.f32 %v794_v33, 0.0  ;;  %v798_v45 = vadd.f32 %v797_v40, %v3016_v7  ;;  %v835_v51 = vmax.f32 %v714_v31, 0.0 }
 0x1fa   : > { %v836_v47 = vmax.f32 %v716_v35, 0.0  ;;  %v868_v50 = vmax.f32 %v796_v39, 0.0 }
 0x1fb   : > { %v837_v53 = vmax.f32 %v718_v42, 0.0  ;;  %v869_v54 = vmax.f32 %v798_v45, 0.0 }
 0x1fc   : > { %v886_v55 = vpack.c.bf16 %v836_v47, %v834_v46  ;;  %v902_v56 = vpack.c.bf16 %v868_v50, %v866_v38 }
 0x1fd   : > { %v887_v57 = vpack.c.bf16 %v837_v53, %v835_v51  ;;  %v721_v58 = vpop.f32.mrb[28].mxu0  ;;  %v903_v59 = vpack.c.bf16 %v869_v54, %v867_v43  ;;  %v801_v60 = vpop.f32.mrb[28].mxu1 }
 0x1fe   : > { %v722_v61 = vadd.f32 %v721_v58, %v3012_v6  ;;  %v723_v62 = vpop.f32.mrb[29].mxu0  ;;  %v802_v63 = vadd.f32 %v801_v60, %v3012_v6  ;;  %v803_v1 = vpop.f32.mrb[29].mxu1 }
 0x1ff   : > { %v724_v2 = vadd.f32 %v723_v62, %v3016_v7  ;;  %v725_v4 = vpop.f32.mrb[30].mxu0  ;;  %1202 = vmatprep.mubr.bf16.mxu1 %v887_v57  ;;  %v804_v8 = vadd.f32 %v803_v1, %v3016_v7  ;;  %v805_v9 = vpop.f32.mrb[30].mxu1 }
 0x200   : > { %v726_v11 = vadd.f32 %v725_v4, %v3012_v6  ;;  %v727_v12 = vpop.f32.mrb[31].mxu0  ;;  %1203 = vmatmul.mubr.bf16.gmra.mrb[56].mxu1 %v886_v55  ;;  %v870_v13 = vmax.f32 %v802_v63, 0.0  ;;  %v806_v15 = vadd.f32 %v805_v9, %v3012_v6  ;;  %v807_v16 = vpop.f32.mrb[31].mxu1  ;;  %v838_v23 = vmax.f32 %v722_v61, 0.0  ;;  %v2356_v6 = vld [vmem:[#allocation11 + $0x78] sm:$0xff]  }
 0x201   : > { %v728_v18 = vadd.f32 %v727_v12, %v3016_v7  ;;  %v871_v19 = vmax.f32 %v804_v8, 0.0  ;;  %v808_v21 = vadd.f32 %v807_v16, %v3016_v7  ;;  %v839_v27 = vmax.f32 %v724_v2, 0.0  ;;  %v2357_v7 = vld [vmem:[#allocation11 + $0x38] sm:$0xff]   ;;  %2026 = vmatprep.subr.bf16.mxu0 %v2356_v6 }
 0x202   : > { %v840_v24 = vmax.f32 %v726_v11, 0.0  ;;  %v872_v26 = vmax.f32 %v806_v15, 0.0  ;;  %2027 = vmatpush3.bf16.msra.mxu0 %v2357_v7 }
 0x203   : > { %v841_v28 = vmax.f32 %v728_v18, 0.0  ;;  %v873_v29 = vmax.f32 %v808_v21, 0.0 }
 0x204   : > { %v888_v30 = vpack.c.bf16 %v840_v24, %v838_v23  ;;  %v904_v31 = vpack.c.bf16 %v872_v26, %v870_v13 }
 0x205   : > { %v889_v32 = vpack.c.bf16 %v841_v28, %v839_v27  ;;  %v905_v33 = vpack.c.bf16 %v873_v29, %v871_v19 }
 0x207   : > { %1212 = vmatprep.mubr.bf16.mxu1 %v889_v32 }
 0x208   : > { %1213 = vmatmul.mubr.bf16.gmra.mrb[60].mxu1 %v888_v30 }
 0x209   : > { %1222 = vmatprep.mubr.bf16.mxu1 %v3028_v41 }
 0x210   : > { %1223 = vmatmul.mubr.bf16.gmra.mrb[64].mxu1 %v3026_v37  ;;  %v938_v37 = vld [vmem:[#allocation10] sm:$0x3] }
 0x211   : > { %1232 = vmatprep.mubr.bf16.mxu1 %v3040_v14  ;;  %v3120_v41 = vrot.slane %v938_v37, %v433_v0 }
 0x218   : > { %1233 = vmatmul.mubr.bf16.gmra.mrb[68].mxu1 %v3038_v10  ;;  %v3124_v10 = vrot.slane %v938_v37, %v437_v5 }
 0x219   : > { %1242 = vmatprep.mubr.bf16.mxu1 %v3052_v48 }
 0x220   : > { %1243 = vmatmul.mubr.bf16.gmra.mrb[72].mxu1 %v3050_v44 }
 0x221   : > { %1252 = vmatprep.mubr.bf16.mxu1 %v3064_v20 }
 0x228   : > { %1253 = vmatmul.mubr.bf16.gmra.mrb[76].mxu1 %v3062_v17 }
 0x229   : > { %1262 = vmatprep.mubr.bf16.mxu1 %v3076_v52 }
 0x230   : > { %1263 = vmatmul.mubr.bf16.gmra.mrb[80].mxu1 %v3074_v49 }
 0x231   : > { %1272 = vmatprep.mubr.bf16.mxu1 %v3088_v25 }
 0x238   : > { %1273 = vmatmul.mubr.bf16.gmra.mrb[84].mxu1 %v3086_v22 }
 0x239   : > { %1282 = vmatprep.mubr.bf16.mxu1 %v903_v59 }
 0x240   : > { %1283 = vmatmul.mubr.bf16.gmra.mrb[88].mxu1 %v902_v56 }
 0x241   : > { %1292 = vmatprep.mubr.bf16.mxu1 %v905_v33 }
 0x248   : > { %1293 = vmatmul.mubr.bf16.gmra.mrb[92].mxu1 %v904_v31 }
 0x2a3   : > { %v1144_v14 = vpop.f32.mrb[32].mxu1 }
 0x2a4   : > { %v1145_v44 = vadd.f32 %v1144_v14, %v3120_v41  ;;  %v1146_v48 = vpop.f32.mrb[33].mxu1 }
 0x2a5   : > { %v1147_v17 = vadd.f32 %v1146_v48, %v3124_v10  ;;  %v1148_v20 = vpop.f32.mrb[34].mxu1 }
 0x2a6   : > { %v1149_v49 = vadd.f32 %v1148_v20, %v3120_v41  ;;  %v1150_v52 = vpop.f32.mrb[35].mxu1  ;;  %v1303_v25 = vmax.f32 %v1145_v44, 0.0 }
 0x2a7   : > { %v1151_v22 = vadd.f32 %v1150_v52, %v3124_v10  ;;  %v1304_v0 = vmax.f32 %v1147_v17, 0.0 }
 0x2a8   : > { %v1305_v34 = vmax.f32 %v1149_v49, 0.0 }
 0x2a9   : > { %v1306_v35 = vmax.f32 %v1151_v22, 0.0 }
 0x2aa   : > { %v1367_v36 = vpack.c.bf16 %v1305_v34, %v1303_v25 }
 0x2ab   : > { %v1368_v3 = vpack.c.bf16 %v1306_v35, %v1304_v0  ;;  %v1154_v5 = vpop.f32.mrb[36].mxu1 }
 0x2ac   : > { %v1155_v38 = vadd.f32 %v1154_v5, %v3120_v41  ;;  %v1156_v39 = vpop.f32.mrb[37].mxu1 }
 0x2ad   : > { %v1157_v40 = vadd.f32 %v1156_v39, %v3124_v10  ;;  %v1158_v42 = vpop.f32.mrb[38].mxu1  ;;  %1566 = vmatprep.mubr.bf16.mxu0 %v1368_v3 }
 0x2ae   : > { %v1159_v43 = vadd.f32 %v1158_v42, %v3120_v41  ;;  %v1160_v45 = vpop.f32.mrb[39].mxu1  ;;  %1567 = vmatmul.mubr.bf16.vlgmr.msra.gmra.mrb[32].mxu0 %v1367_v36  ;;  %v1307_v47 = vmax.f32 %v1155_v38, 0.0 }
 0x2af   : > { %v1161_v46 = vadd.f32 %v1160_v45, %v3124_v10  ;;  %v1308_v51 = vmax.f32 %v1157_v40, 0.0 }
 0x2b0   : > { %v1309_v50 = vmax.f32 %v1159_v43, 0.0 }
 0x2b1   : > { %v1310_v53 = vmax.f32 %v1161_v46, 0.0 }
 0x2b2   : > { %v1369_v54 = vpack.c.bf16 %v1309_v50, %v1307_v47 }
 0x2b3   : > { %v1370_v55 = vpack.c.bf16 %v1310_v53, %v1308_v51  ;;  %v1164_v56 = vpop.f32.mrb[40].mxu1 }
 0x2b4   : > { %v1165_v57 = vadd.f32 %v1164_v56, %v3120_v41  ;;  %v1166_v58 = vpop.f32.mrb[41].mxu1 }
 0x2b5   : > { %v1167_v59 = vadd.f32 %v1166_v58, %v3124_v10  ;;  %v1168_v60 = vpop.f32.mrb[42].mxu1  ;;  %1574 = vmatprep.mubr.bf16.mxu0 %v1370_v55 }
 0x2b6   : > { %v1169_v61 = vadd.f32 %v1168_v60, %v3120_v41  ;;  %v1170_v62 = vpop.f32.mrb[43].mxu1  ;;  %1575 = vmatmul.mubr.bf16.gmra.mrb[36].mxu0 %v1369_v54  ;;  %v1311_v1 = vmax.f32 %v1165_v57, 0.0 }
 0x2b7   : > { %v1171_v63 = vadd.f32 %v1170_v62, %v3124_v10  ;;  %v1312_v4 = vmax.f32 %v1167_v59, 0.0 }
 0x2b8   : > { %v1313_v2 = vmax.f32 %v1169_v61, 0.0 }
 0x2b9   : > { %v1314_v8 = vmax.f32 %v1171_v63, 0.0 }
 0x2ba   : > { %v1371_v9 = vpack.c.bf16 %v1313_v2, %v1311_v1 }
 0x2bb   : > { %v1372_v11 = vpack.c.bf16 %v1314_v8, %v1312_v4  ;;  %v1174_v12 = vpop.f32.mrb[44].mxu1 }
 0x2bc   : > { %v1175_v13 = vadd.f32 %v1174_v12, %v3120_v41  ;;  %v1176_v15 = vpop.f32.mrb[45].mxu1 }
 0x2bd   : > { %v1177_v16 = vadd.f32 %v1176_v15, %v3124_v10  ;;  %v1178_v18 = vpop.f32.mrb[46].mxu1  ;;  %1582 = vmatprep.mubr.bf16.mxu0 %v1372_v11 }
 0x2be   : > { %v1179_v19 = vadd.f32 %v1178_v18, %v3120_v41  ;;  %v1180_v21 = vpop.f32.mrb[47].mxu1  ;;  %1583 = vmatmul.mubr.bf16.gmra.mrb[40].mxu0 %v1371_v9  ;;  %v1315_v24 = vmax.f32 %v1175_v13, 0.0 }
 0x2bf   : > { %v1181_v23 = vadd.f32 %v1180_v21, %v3124_v10  ;;  %v1316_v27 = vmax.f32 %v1177_v16, 0.0 }
 0x2c0   : > { %v1317_v26 = vmax.f32 %v1179_v19, 0.0 }
 0x2c1   : > { %v1318_v28 = vmax.f32 %v1181_v23, 0.0 }
 0x2c2   : > { %v1373_v29 = vpack.c.bf16 %v1317_v26, %v1315_v24 }
 0x2c3   : > { %v1374_v30 = vpack.c.bf16 %v1318_v28, %v1316_v27  ;;  %v1184_v31 = vpop.f32.mrb[48].mxu1 }
 0x2c4   : > { %v1185_v32 = vadd.f32 %v1184_v31, %v3120_v41  ;;  %v1186_v33 = vpop.f32.mrb[49].mxu1 }
 0x2c5   : > { %v1187_v6 = vadd.f32 %v1186_v33, %v3124_v10  ;;  %v1188_v7 = vpop.f32.mrb[50].mxu1  ;;  %1590 = vmatprep.mubr.bf16.mxu0 %v1374_v30 }
 0x2c6   : > { %v1189_v37 = vadd.f32 %v1188_v7, %v3120_v41  ;;  %v1190_v14 = vpop.f32.mrb[51].mxu1  ;;  %1591 = vmatmul.mubr.bf16.gmra.mrb[44].mxu0 %v1373_v29  ;;  %v1319_v48 = vmax.f32 %v1185_v32, 0.0 }
 0x2c7   : > { %v1191_v44 = vadd.f32 %v1190_v14, %v3124_v10  ;;  %v1320_v20 = vmax.f32 %v1187_v6, 0.0 }
 0x2c8   : > { %v1321_v17 = vmax.f32 %v1189_v37, 0.0 }
 0x2c9   : > { %v1322_v49 = vmax.f32 %v1191_v44, 0.0 }
 0x2ca   : > { %v1375_v52 = vpack.c.bf16 %v1321_v17, %v1319_v48 }
 0x2cb   : > { %v1376_v22 = vpack.c.bf16 %v1322_v49, %v1320_v20  ;;  %v1194_v25 = vpop.f32.mrb[52].mxu1 }
 0x2cc   : > { %v1195_v34 = vadd.f32 %v1194_v25, %v3120_v41  ;;  %v1196_v0 = vpop.f32.mrb[53].mxu1 }
 0x2cd   : > { %v1197_v35 = vadd.f32 %v1196_v0, %v3124_v10  ;;  %v1198_v36 = vpop.f32.mrb[54].mxu1  ;;  %1598 = vmatprep.mubr.bf16.mxu0 %v1376_v22 }
 0x2ce   : > { %v1199_v3 = vadd.f32 %v1198_v36, %v3120_v41  ;;  %v1200_v5 = vpop.f32.mrb[55].mxu1  ;;  %1599 = vmatmul.mubr.bf16.gmra.mrb[48].mxu0 %v1375_v52  ;;  %v1323_v39 = vmax.f32 %v1195_v34, 0.0 }
 0x2cf   : > { %v1201_v38 = vadd.f32 %v1200_v5, %v3124_v10  ;;  %v1324_v42 = vmax.f32 %v1197_v35, 0.0 }
 0x2d0   : > { %v1325_v40 = vmax.f32 %v1199_v3, 0.0 }
 0x2d1   : > { %v1326_v43 = vmax.f32 %v1201_v38, 0.0 }
 0x2d2   : > { %v1377_v45 = vpack.c.bf16 %v1325_v40, %v1323_v39 }
 0x2d3   : > { %v1378_v46 = vpack.c.bf16 %v1326_v43, %v1324_v42  ;;  %v1204_v47 = vpop.f32.mrb[56].mxu1 }
 0x2d4   : > { %v1205_v50 = vadd.f32 %v1204_v47, %v3120_v41  ;;  %v1206_v51 = vpop.f32.mrb[57].mxu1 }
 0x2d5   : > { %v1207_v53 = vadd.f32 %v1206_v51, %v3124_v10  ;;  %v1208_v54 = vpop.f32.mrb[58].mxu1  ;;  %1606 = vmatprep.mubr.bf16.mxu0 %v1378_v46 }
 0x2d6   : > { %v1209_v55 = vadd.f32 %v1208_v54, %v3120_v41  ;;  %v1210_v56 = vpop.f32.mrb[59].mxu1  ;;  %1607 = vmatmul.mubr.bf16.gmra.mrb[52].mxu0 %v1377_v45  ;;  %v1327_v58 = vmax.f32 %v1205_v50, 0.0 }
 0x2d7   : > { %v1211_v57 = vadd.f32 %v1210_v56, %v3124_v10  ;;  %v1328_v60 = vmax.f32 %v1207_v53, 0.0 }
 0x2d8   : > { %v1329_v59 = vmax.f32 %v1209_v55, 0.0 }
 0x2d9   : > { %v1330_v61 = vmax.f32 %v1211_v57, 0.0 }
 0x2da   : > { %v1379_v62 = vpack.c.bf16 %v1329_v59, %v1327_v58 }
 0x2db   : > { %v1380_v63 = vpack.c.bf16 %v1330_v61, %v1328_v60  ;;  %v1214_v1 = vpop.f32.mrb[60].mxu1 }
 0x2dc   : > { %v1215_v2 = vadd.f32 %v1214_v1, %v3120_v41  ;;  %v1216_v4 = vpop.f32.mrb[61].mxu1 }
 0x2dd   : > { %v1217_v8 = vadd.f32 %v1216_v4, %v3124_v10  ;;  %v1218_v9 = vpop.f32.mrb[62].mxu1  ;;  %1614 = vmatprep.mubr.bf16.mxu0 %v1380_v63 }
 0x2de   : > { %v1219_v11 = vadd.f32 %v1218_v9, %v3120_v41  ;;  %v1220_v12 = vpop.f32.mrb[63].mxu1  ;;  %1615 = vmatmul.mubr.bf16.gmra.mrb[56].mxu0 %v1379_v62  ;;  %v1331_v15 = vmax.f32 %v1215_v2, 0.0 }
 0x2df   : > { %v1221_v13 = vadd.f32 %v1220_v12, %v3124_v10  ;;  %v1332_v18 = vmax.f32 %v1217_v8, 0.0 }
 0x2e0   : > { %v1333_v16 = vmax.f32 %v1219_v11, 0.0 }
 0x2e1   : > { %v1334_v19 = vmax.f32 %v1221_v13, 0.0 }
 0x2e2   : > { %v1381_v21 = vpack.c.bf16 %v1333_v16, %v1331_v15 }
 0x2e3   : > { %v1382_v23 = vpack.c.bf16 %v1334_v19, %v1332_v18  ;;  %v1224_v24 = vpop.f32.mrb[64].mxu1 }
 0x2e4   : > { %v1225_v26 = vadd.f32 %v1224_v24, %v3120_v41  ;;  %v1226_v27 = vpop.f32.mrb[65].mxu1 }
 0x2e5   : > { %v1227_v28 = vadd.f32 %v1226_v27, %v3124_v10  ;;  %v1228_v29 = vpop.f32.mrb[66].mxu1  ;;  %1622 = vmatprep.mubr.bf16.mxu0 %v1382_v23 }
 0x2e6   : > { %v1229_v30 = vadd.f32 %v1228_v29, %v3120_v41  ;;  %v1230_v31 = vpop.f32.mrb[67].mxu1  ;;  %1623 = vmatmul.mubr.bf16.gmra.mrb[60].mxu0 %v1381_v21  ;;  %v1335_v33 = vmax.f32 %v1225_v26, 0.0 }
 0x2e7   : > { %v1231_v32 = vadd.f32 %v1230_v31, %v3124_v10  ;;  %v1336_v7 = vmax.f32 %v1227_v28, 0.0 }
 0x2e8   : > { %v1337_v6 = vmax.f32 %v1229_v30, 0.0 }
 0x2e9   : > { %v1338_v37 = vmax.f32 %v1231_v32, 0.0 }
 0x2ea   : > { %v1383_v14 = vpack.c.bf16 %v1337_v6, %v1335_v33 }
 0x2eb   : > { %v1384_v44 = vpack.c.bf16 %v1338_v37, %v1336_v7  ;;  %v1234_v48 = vpop.f32.mrb[68].mxu1 }
 0x2ec   : > { %v1235_v17 = vadd.f32 %v1234_v48, %v3120_v41  ;;  %v1236_v20 = vpop.f32.mrb[69].mxu1 }
 0x2ed   : > { %v1237_v49 = vadd.f32 %v1236_v20, %v3124_v10  ;;  %v1238_v52 = vpop.f32.mrb[70].mxu1  ;;  %1630 = vmatprep.mubr.bf16.mxu0 %v1384_v44 }
 0x2ee   : > { %v1239_v22 = vadd.f32 %v1238_v52, %v3120_v41  ;;  %v1240_v25 = vpop.f32.mrb[71].mxu1  ;;  %1631 = vmatmul.mubr.bf16.gmra.mrb[64].mxu0 %v1383_v14  ;;  %v1339_v0 = vmax.f32 %v1235_v17, 0.0 }
 0x2ef   : > { %v1241_v34 = vadd.f32 %v1240_v25, %v3124_v10  ;;  %v1340_v36 = vmax.f32 %v1237_v49, 0.0 }
 0x2f0   : > { %v1341_v35 = vmax.f32 %v1239_v22, 0.0 }
 0x2f1   : > { %v1342_v3 = vmax.f32 %v1241_v34, 0.0 }
 0x2f2   : > { %v1385_v5 = vpack.c.bf16 %v1341_v35, %v1339_v0 }
 0x2f3   : > { %v1386_v38 = vpack.c.bf16 %v1342_v3, %v1340_v36  ;;  %v1244_v39 = vpop.f32.mrb[72].mxu1 }
 0x2f4   : > { %v1245_v40 = vadd.f32 %v1244_v39, %v3120_v41  ;;  %v1246_v42 = vpop.f32.mrb[73].mxu1 }
 0x2f5   : > { %v1247_v43 = vadd.f32 %v1246_v42, %v3124_v10  ;;  %v1248_v45 = vpop.f32.mrb[74].mxu1  ;;  %1638 = vmatprep.mubr.bf16.mxu0 %v1386_v38 }
 0x2f6   : > { %v1249_v46 = vadd.f32 %v1248_v45, %v3120_v41  ;;  %v1250_v47 = vpop.f32.mrb[75].mxu1  ;;  %1639 = vmatmul.mubr.bf16.gmra.mrb[68].mxu0 %v1385_v5  ;;  %v1343_v51 = vmax.f32 %v1245_v40, 0.0 }
 0x2f7   : > { %v1251_v50 = vadd.f32 %v1250_v47, %v3124_v10  ;;  %v1344_v54 = vmax.f32 %v1247_v43, 0.0 }
 0x2f8   : > { %v1345_v53 = vmax.f32 %v1249_v46, 0.0 }
 0x2f9   : > { %v1346_v55 = vmax.f32 %v1251_v50, 0.0 }
 0x2fa   : > { %v1387_v56 = vpack.c.bf16 %v1345_v53, %v1343_v51 }
 0x2fb   : > { %v1388_v57 = vpack.c.bf16 %v1346_v55, %v1344_v54  ;;  %v1254_v58 = vpop.f32.mrb[76].mxu1 }
 0x2fc   : > { %v1255_v59 = vadd.f32 %v1254_v58, %v3120_v41  ;;  %v1256_v60 = vpop.f32.mrb[77].mxu1 }
 0x2fd   : > { %v1257_v61 = vadd.f32 %v1256_v60, %v3124_v10  ;;  %v1258_v62 = vpop.f32.mrb[78].mxu1  ;;  %1646 = vmatprep.mubr.bf16.mxu0 %v1388_v57 }
 0x2fe   : > { %v1259_v63 = vadd.f32 %v1258_v62, %v3120_v41  ;;  %v1260_v1 = vpop.f32.mrb[79].mxu1  ;;  %1647 = vmatmul.mubr.bf16.gmra.mrb[72].mxu0 %v1387_v56  ;;  %v1347_v4 = vmax.f32 %v1255_v59, 0.0 }
 0x2ff   : > { %v1261_v2 = vadd.f32 %v1260_v1, %v3124_v10  ;;  %v1348_v9 = vmax.f32 %v1257_v61, 0.0 }
 0x300   : > { %v1349_v8 = vmax.f32 %v1259_v63, 0.0 }
 0x301   : > { %v1350_v11 = vmax.f32 %v1261_v2, 0.0 }
 0x302   : > { %v1389_v12 = vpack.c.bf16 %v1349_v8, %v1347_v4  ;;  %v3190_v8 = vld [vmem:[#allocation13] ss:$0 sm:$0xff] }
 0x303   : > { %v1390_v13 = vpack.c.bf16 %v1350_v11, %v1348_v9  ;;  %v1264_v15 = vpop.f32.mrb[80].mxu1 }
 0x304   : > { %v1265_v16 = vadd.f32 %v1264_v15, %v3120_v41  ;;  %v1266_v18 = vpop.f32.mrb[81].mxu1 }
 0x305   : > { %v1267_v19 = vadd.f32 %v1266_v18, %v3124_v10  ;;  %v1268_v21 = vpop.f32.mrb[82].mxu1  ;;  %1654 = vmatprep.mubr.bf16.mxu0 %v1390_v13 }
 0x306   : > { %v1269_v23 = vadd.f32 %v1268_v21, %v3120_v41  ;;  %v1270_v24 = vpop.f32.mrb[83].mxu1  ;;  %1655 = vmatmul.mubr.bf16.gmra.mrb[76].mxu0 %v1389_v12  ;;  %v1351_v27 = vmax.f32 %v1265_v16, 0.0 }
 0x307   : > { %v1271_v26 = vadd.f32 %v1270_v24, %v3124_v10  ;;  %v1352_v29 = vmax.f32 %v1267_v19, 0.0 }
 0x308   : > { %v1353_v28 = vmax.f32 %v1269_v23, 0.0 }
 0x309   : > { %v1354_v30 = vmax.f32 %v1271_v26, 0.0 }
 0x30a   : > { %v1391_v31 = vpack.c.bf16 %v1353_v28, %v1351_v27 }
 0x30b   : > { %v1392_v32 = vpack.c.bf16 %v1354_v30, %v1352_v29  ;;  %v1274_v33 = vpop.f32.mrb[84].mxu1 }
 0x30c   : > { %v1275_v6 = vadd.f32 %v1274_v33, %v3120_v41  ;;  %v1276_v7 = vpop.f32.mrb[85].mxu1 }
 0x30d   : > { %v1277_v37 = vadd.f32 %v1276_v7, %v3124_v10  ;;  %v1278_v14 = vpop.f32.mrb[86].mxu1  ;;  %1662 = vmatprep.mubr.bf16.mxu0 %v1392_v32 }
 0x30e   : > { %v1279_v44 = vadd.f32 %v1278_v14, %v3120_v41  ;;  %v1280_v48 = vpop.f32.mrb[87].mxu1  ;;  %1663 = vmatmul.mubr.bf16.gmra.mrb[80].mxu0 %v1391_v31  ;;  %v1355_v20 = vmax.f32 %v1275_v6, 0.0 }
 0x30f   : > { %v1281_v17 = vadd.f32 %v1280_v48, %v3124_v10  ;;  %v1356_v52 = vmax.f32 %v1277_v37, 0.0 }
 0x310   : > { %v1357_v49 = vmax.f32 %v1279_v44, 0.0 }
 0x311   : > { %v1358_v22 = vmax.f32 %v1281_v17, 0.0 }
 0x312   : > { %v1393_v25 = vpack.c.bf16 %v1357_v49, %v1355_v20 }
 0x313   : > { %v1394_v34 = vpack.c.bf16 %v1358_v22, %v1356_v52  ;;  %v1284_v0 = vpop.f32.mrb[88].mxu1 }
 0x314   : > { %v1285_v35 = vadd.f32 %v1284_v0, %v3120_v41  ;;  %v1286_v36 = vpop.f32.mrb[89].mxu1 }
 0x315   : > { %v1287_v3 = vadd.f32 %v1286_v36, %v3124_v10  ;;  %v1288_v5 = vpop.f32.mrb[90].mxu1  ;;  %1670 = vmatprep.mubr.bf16.mxu0 %v1394_v34 }
 0x316   : > { %v1289_v38 = vadd.f32 %v1288_v5, %v3120_v41  ;;  %v1290_v39 = vpop.f32.mrb[91].mxu1  ;;  %1671 = vmatmul.mubr.bf16.gmra.mrb[84].mxu0 %v1393_v25  ;;  %v1359_v42 = vmax.f32 %v1285_v35, 0.0 }
 0x317   : > { %v1291_v40 = vadd.f32 %v1290_v39, %v3124_v10  ;;  %v1360_v45 = vmax.f32 %v1287_v3, 0.0 }
 0x318   : > { %v1361_v43 = vmax.f32 %v1289_v38, 0.0 }
 0x319   : > { %v1362_v46 = vmax.f32 %v1291_v40, 0.0 }
 0x31a   : > { %v1395_v47 = vpack.c.bf16 %v1361_v43, %v1359_v42 }
 0x31b   : > { %v1396_v50 = vpack.c.bf16 %v1362_v46, %v1360_v45  ;;  %v1294_v51 = vpop.f32.mrb[92].mxu1 }
 0x31c   : > { %v1295_v53 = vadd.f32 %v1294_v51, %v3120_v41  ;;  %v1296_v54 = vpop.f32.mrb[93].mxu1 }
 0x31d   : > { %v1297_v55 = vadd.f32 %v1296_v54, %v3124_v10  ;;  %v1298_v56 = vpop.f32.mrb[94].mxu1  ;;  %1678 = vmatprep.mubr.bf16.mxu0 %v1396_v50 }
 0x31e   : > { %v1299_v57 = vadd.f32 %v1298_v56, %v3120_v41  ;;  %v1300_v58 = vpop.f32.mrb[95].mxu1  ;;  %1679 = vmatmul.mubr.bf16.gmra.mrb[88].mxu0 %v1395_v47  ;;  %v1363_v60 = vmax.f32 %v1295_v53, 0.0 }
 0x31f   : > { %v1301_v59 = vadd.f32 %v1300_v58, %v3124_v10  ;;  %v1364_v62 = vmax.f32 %v1297_v55, 0.0 }
 0x320   : > { %v1365_v61 = vmax.f32 %v1299_v57, 0.0 }
 0x321   : > { %v1366_v63 = vmax.f32 %v1301_v59, 0.0 }
 0x322   : > { %v1397_v1 = vpack.c.bf16 %v1365_v61, %v1363_v60 }
 0x323   : > { %v1398_v2 = vpack.c.bf16 %v1366_v63, %v1364_v62 }
 0x325   : > { %1686 = vmatprep.mubr.bf16.mxu0 %v1398_v2 }
 0x326   : > { %1687 = vmatmul.mubr.bf16.gmra.mrb[92].mxu0 %v1397_v1 }
 0x381   : > { %v2028_v4 = vpop.f32.mrb[32].mxu0 }
 0x382   : > { %v2029_v9 = vpop.f32.mrb[33].mxu0 }
 0x383   : > { %v2030_v11 = vadd.f32 %v2029_v9, %v2028_v4  ;;  %v2031_v12 = vpop.f32.mrb[34].mxu0 }
 0x384   : > { %v2032_v41 = vpop.f32.mrb[35].mxu0 }
 0x385   : > { %v1569_v13 = vadd.f32 %v2030_v11, %v3190_v8  ;;  %v2033_v15 = vadd.f32 %v2032_v41, %v2031_v12 }
 0x387   : > { %v1695_v10 = vmax.f32 %v1569_v13, 0.0  ;;  %v1572_v16 = vadd.f32 %v2033_v15, %v3190_v8 }
 0x389   : > { %1727 = vst [vmem:[%s3195_s23] sm:$0xff] %v1695_v10  ;;  %v1696_v18 = vmax.f32 %v1572_v16, 0.0  ;;  %v2034_v19 = vpop.f32.mrb[36].mxu0 }
 0x38a   : > { %v2035_v21 = vpop.f32.mrb[37].mxu0 }
 0x38b   : > { %1728 = vst [vmem:[%s3195_s23 + $0x8] sm:$0xff] %v1696_v18  ;;  %v2036_v23 = vadd.f32 %v2035_v21, %v2034_v19  ;;  %v2037_v24 = vpop.f32.mrb[38].mxu0 }
 0x38c   : > { %v2038_v26 = vpop.f32.mrb[39].mxu0 }
 0x38d   : > { %v1577_v27 = vadd.f32 %v2036_v23, %v3190_v8  ;;  %v2039_v28 = vadd.f32 %v2038_v26, %v2037_v24 }
 0x38f   : > { %v1697_v29 = vmax.f32 %v1577_v27, 0.0  ;;  %v1580_v30 = vadd.f32 %v2039_v28, %v3190_v8 }
 0x391   : > { %1729 = vst [vmem:[%s3195_s23 + $0x10] sm:$0xff] %v1697_v29  ;;  %v1698_v31 = vmax.f32 %v1580_v30, 0.0  ;;  %v2040_v32 = vpop.f32.mrb[40].mxu0 }
 0x392   : > { %v2041_v33 = vpop.f32.mrb[41].mxu0 }
 0x393   : > { %1730 = vst [vmem:[%s3195_s23 + $0x18] sm:$0xff] %v1698_v31  ;;  %v2042_v6 = vadd.f32 %v2041_v33, %v2040_v32  ;;  %v2043_v7 = vpop.f32.mrb[42].mxu0 }
 0x394   : > { %v2044_v37 = vpop.f32.mrb[43].mxu0 }
 0x395   : > { %v1585_v14 = vadd.f32 %v2042_v6, %v3190_v8  ;;  %v2045_v44 = vadd.f32 %v2044_v37, %v2043_v7 }
 0x397   : > { %v1699_v48 = vmax.f32 %v1585_v14, 0.0  ;;  %v1588_v17 = vadd.f32 %v2045_v44, %v3190_v8 }
 0x399   : > { %1731 = vst [vmem:[%s3195_s23 + $0x20] sm:$0xff] %v1699_v48  ;;  %v1700_v20 = vmax.f32 %v1588_v17, 0.0  ;;  %v2046_v49 = vpop.f32.mrb[44].mxu0 }
 0x39a   : > { %v2047_v52 = vpop.f32.mrb[45].mxu0 }
 0x39b   : > { %1732 = vst [vmem:[%s3195_s23 + $0x28] sm:$0xff] %v1700_v20  ;;  %v2048_v22 = vadd.f32 %v2047_v52, %v2046_v49  ;;  %v2049_v25 = vpop.f32.mrb[46].mxu0 }
 0x39c   : > { %v2050_v34 = vpop.f32.mrb[47].mxu0 }
 0x39d   : > { %v1593_v0 = vadd.f32 %v2048_v22, %v3190_v8  ;;  %v2051_v35 = vadd.f32 %v2050_v34, %v2049_v25 }
 0x39f   : > { %v1701_v36 = vmax.f32 %v1593_v0, 0.0  ;;  %v1596_v3 = vadd.f32 %v2051_v35, %v3190_v8 }
 0x3a1   : > { %1733 = vst [vmem:[%s3195_s23 + $0x30] sm:$0xff] %v1701_v36  ;;  %v1702_v5 = vmax.f32 %v1596_v3, 0.0  ;;  %v2052_v38 = vpop.f32.mrb[48].mxu0 }
 0x3a2   : > { %v2053_v39 = vpop.f32.mrb[49].mxu0 }
 0x3a3   : > { %1734 = vst [vmem:[%s3195_s23 + $0x38] sm:$0xff] %v1702_v5  ;;  %v2054_v40 = vadd.f32 %v2053_v39, %v2052_v38  ;;  %v2055_v42 = vpop.f32.mrb[50].mxu0 }
 0x3a4   : > { %v2056_v43 = vpop.f32.mrb[51].mxu0 }
 0x3a5   : > { %v1601_v45 = vadd.f32 %v2054_v40, %v3190_v8  ;;  %v2057_v46 = vadd.f32 %v2056_v43, %v2055_v42 }
 0x3a7   : > { %v1703_v47 = vmax.f32 %v1601_v45, 0.0  ;;  %v1604_v50 = vadd.f32 %v2057_v46, %v3190_v8 }
 0x3a9   : > { %1735 = vst [vmem:[%s3195_s23 + $0x40] sm:$0xff] %v1703_v47  ;;  %v1704_v51 = vmax.f32 %v1604_v50, 0.0  ;;  %v2058_v53 = vpop.f32.mrb[52].mxu0 }
 0x3aa   : > { %v2059_v54 = vpop.f32.mrb[53].mxu0 }
 0x3ab   : > { %1736 = vst [vmem:[%s3195_s23 + $0x48] sm:$0xff] %v1704_v51  ;;  %v2060_v55 = vadd.f32 %v2059_v54, %v2058_v53  ;;  %v2061_v56 = vpop.f32.mrb[54].mxu0 }
 0x3ac   : > { %v2062_v57 = vpop.f32.mrb[55].mxu0 }
 0x3ad   : > { %v1609_v58 = vadd.f32 %v2060_v55, %v3190_v8  ;;  %v2063_v59 = vadd.f32 %v2062_v57, %v2061_v56 }
 0x3af   : > { %v1705_v60 = vmax.f32 %v1609_v58, 0.0  ;;  %v1612_v61 = vadd.f32 %v2063_v59, %v3190_v8 }
 0x3b1   : > { %1737 = vst [vmem:[%s3195_s23 + $0x50] sm:$0xff] %v1705_v60  ;;  %v1706_v62 = vmax.f32 %v1612_v61, 0.0  ;;  %v2064_v63 = vpop.f32.mrb[56].mxu0 }
 0x3b2   : > { %v2065_v1 = vpop.f32.mrb[57].mxu0 }
 0x3b3   : > { %1738 = vst [vmem:[%s3195_s23 + $0x58] sm:$0xff] %v1706_v62  ;;  %v2066_v2 = vadd.f32 %v2065_v1, %v2064_v63  ;;  %v2067_v4 = vpop.f32.mrb[58].mxu0 }
 0x3b4   : > { %v2068_v9 = vpop.f32.mrb[59].mxu0 }
 0x3b5   : > { %v1617_v11 = vadd.f32 %v2066_v2, %v3190_v8  ;;  %v2069_v12 = vadd.f32 %v2068_v9, %v2067_v4 }
 0x3b7   : > { %v1707_v41 = vmax.f32 %v1617_v11, 0.0  ;;  %v1620_v13 = vadd.f32 %v2069_v12, %v3190_v8 }
 0x3b9   : > { %1739 = vst [vmem:[%s3195_s23 + $0x60] sm:$0xff] %v1707_v41  ;;  %v1708_v15 = vmax.f32 %v1620_v13, 0.0  ;;  %v2070_v10 = vpop.f32.mrb[60].mxu0 }
 0x3ba   : > { %v2071_v16 = vpop.f32.mrb[61].mxu0 }
 0x3bb   : > { %1740 = vst [vmem:[%s3195_s23 + $0x68] sm:$0xff] %v1708_v15  ;;  %v2072_v18 = vadd.f32 %v2071_v16, %v2070_v10  ;;  %v2073_v19 = vpop.f32.mrb[62].mxu0 }
 0x3bc   : > { %v2074_v21 = vpop.f32.mrb[63].mxu0 }
 0x3bd   : > { %v1625_v23 = vadd.f32 %v2072_v18, %v3190_v8  ;;  %v2075_v24 = vadd.f32 %v2074_v21, %v2073_v19 }
 0x3bf   : > { %v1709_v26 = vmax.f32 %v1625_v23, 0.0  ;;  %v1628_v27 = vadd.f32 %v2075_v24, %v3190_v8 }
 0x3c1   : > { %1741 = vst [vmem:[%s3195_s23 + $0x70] sm:$0xff] %v1709_v26  ;;  %v1710_v28 = vmax.f32 %v1628_v27, 0.0  ;;  %v2076_v29 = vpop.f32.mrb[64].mxu0 }
 0x3c2   : > { %v2077_v30 = vpop.f32.mrb[65].mxu0 }
 0x3c3   : > { %1742 = vst [vmem:[%s3195_s23 + $0x78] sm:$0xff] %v1710_v28  ;;  %v2078_v31 = vadd.f32 %v2077_v30, %v2076_v29  ;;  %v2079_v32 = vpop.f32.mrb[66].mxu0 }
 0x3c4   : > { %v2080_v33 = vpop.f32.mrb[67].mxu0 }
 0x3c5   : > { %v1633_v6 = vadd.f32 %v2078_v31, %v3190_v8  ;;  %v2081_v7 = vadd.f32 %v2080_v33, %v2079_v32 }
 0x3c7   : > { %v1711_v37 = vmax.f32 %v1633_v6, 0.0  ;;  %v1636_v14 = vadd.f32 %v2081_v7, %v3190_v8 }
 0x3c9   : > { %1743 = vst [vmem:[%s3195_s23 + $0x80] sm:$0xff] %v1711_v37  ;;  %v1712_v44 = vmax.f32 %v1636_v14, 0.0  ;;  %v2082_v48 = vpop.f32.mrb[68].mxu0 }
 0x3ca   : > { %v2083_v17 = vpop.f32.mrb[69].mxu0 }
 0x3cb   : > { %1744 = vst [vmem:[%s3195_s23 + $0x88] sm:$0xff] %v1712_v44  ;;  %v2084_v20 = vadd.f32 %v2083_v17, %v2082_v48  ;;  %v2085_v49 = vpop.f32.mrb[70].mxu0 }
 0x3cc   : > { %v2086_v52 = vpop.f32.mrb[71].mxu0 }
 0x3cd   : > { %v1641_v22 = vadd.f32 %v2084_v20, %v3190_v8  ;;  %v2087_v25 = vadd.f32 %v2086_v52, %v2085_v49 }
 0x3cf   : > { %v1713_v34 = vmax.f32 %v1641_v22, 0.0  ;;  %v1644_v0 = vadd.f32 %v2087_v25, %v3190_v8 }
 0x3d1   : > { %1745 = vst [vmem:[%s3195_s23 + $0x90] sm:$0xff] %v1713_v34  ;;  %v1714_v35 = vmax.f32 %v1644_v0, 0.0  ;;  %v2088_v36 = vpop.f32.mrb[72].mxu0 }
 0x3d2   : > { %v2089_v3 = vpop.f32.mrb[73].mxu0 }
 0x3d3   : > { %1746 = vst [vmem:[%s3195_s23 + $0x98] sm:$0xff] %v1714_v35  ;;  %v2090_v5 = vadd.f32 %v2089_v3, %v2088_v36  ;;  %v2091_v38 = vpop.f32.mrb[74].mxu0 }
 0x3d4   : > { %v2092_v39 = vpop.f32.mrb[75].mxu0 }
 0x3d5   : > { %v1649_v40 = vadd.f32 %v2090_v5, %v3190_v8  ;;  %v2093_v42 = vadd.f32 %v2092_v39, %v2091_v38 }
 0x3d7   : > { %v1715_v43 = vmax.f32 %v1649_v40, 0.0  ;;  %v1652_v45 = vadd.f32 %v2093_v42, %v3190_v8 }
 0x3d9   : > { %1747 = vst [vmem:[%s3195_s23 + $0xa0] sm:$0xff] %v1715_v43  ;;  %v1716_v46 = vmax.f32 %v1652_v45, 0.0  ;;  %v2094_v47 = vpop.f32.mrb[76].mxu0 }
 0x3da   : > { %v2095_v50 = vpop.f32.mrb[77].mxu0 }
 0x3db   : > { %1748 = vst [vmem:[%s3195_s23 + $0xa8] sm:$0xff] %v1716_v46  ;;  %v2096_v51 = vadd.f32 %v2095_v50, %v2094_v47  ;;  %v2097_v53 = vpop.f32.mrb[78].mxu0 }
 0x3dc   : > { %v2098_v54 = vpop.f32.mrb[79].mxu0 }
 0x3dd   : > { %v1657_v55 = vadd.f32 %v2096_v51, %v3190_v8  ;;  %v2099_v56 = vadd.f32 %v2098_v54, %v2097_v53 }
 0x3df   : > { %v1717_v57 = vmax.f32 %v1657_v55, 0.0  ;;  %v1660_v58 = vadd.f32 %v2099_v56, %v3190_v8 }
 0x3e1   : > { %1749 = vst [vmem:[%s3195_s23 + $0xb0] sm:$0xff] %v1717_v57  ;;  %v1718_v59 = vmax.f32 %v1660_v58, 0.0  ;;  %v2100_v60 = vpop.f32.mrb[80].mxu0 }
 0x3e2   : > { %v2101_v61 = vpop.f32.mrb[81].mxu0 }
 0x3e3   : > { %1750 = vst [vmem:[%s3195_s23 + $0xb8] sm:$0xff] %v1718_v59  ;;  %v2102_v62 = vadd.f32 %v2101_v61, %v2100_v60  ;;  %v2103_v63 = vpop.f32.mrb[82].mxu0 }
 0x3e4   : > { %v2104_v1 = vpop.f32.mrb[83].mxu0 }
 0x3e5   : > { %v1665_v2 = vadd.f32 %v2102_v62, %v3190_v8  ;;  %v2105_v4 = vadd.f32 %v2104_v1, %v2103_v63 }
 0x3e7   : > { %v1719_v9 = vmax.f32 %v1665_v2, 0.0  ;;  %v1668_v11 = vadd.f32 %v2105_v4, %v3190_v8 }
 0x3e9   : > { %1751 = vst [vmem:[%s3195_s23 + $0xc0] sm:$0xff] %v1719_v9  ;;  %v1720_v12 = vmax.f32 %v1668_v11, 0.0  ;;  %v2106_v41 = vpop.f32.mrb[84].mxu0 }
 0x3ea   : > { %v2107_v13 = vpop.f32.mrb[85].mxu0 }
 0x3eb   : > { %1752 = vst [vmem:[%s3195_s23 + $0xc8] sm:$0xff] %v1720_v12  ;;  %v2108_v15 = vadd.f32 %v2107_v13, %v2106_v41  ;;  %v2109_v10 = vpop.f32.mrb[86].mxu0 }
 0x3ec   : > { %v2110_v16 = vpop.f32.mrb[87].mxu0 }
 0x3ed   : > { %v1673_v18 = vadd.f32 %v2108_v15, %v3190_v8  ;;  %v2111_v19 = vadd.f32 %v2110_v16, %v2109_v10 }
 0x3ef   : > { %v1721_v21 = vmax.f32 %v1673_v18, 0.0  ;;  %v1676_v23 = vadd.f32 %v2111_v19, %v3190_v8 }
 0x3f1   : > { %1753 = vst [vmem:[%s3195_s23 + $0xd0] sm:$0xff] %v1721_v21  ;;  %v1722_v24 = vmax.f32 %v1676_v23, 0.0  ;;  %v2112_v26 = vpop.f32.mrb[88].mxu0 }
 0x3f2   : > { %v2113_v27 = vpop.f32.mrb[89].mxu0 }
 0x3f3   : > { %1754 = vst [vmem:[%s3195_s23 + $0xd8] sm:$0xff] %v1722_v24  ;;  %v2114_v28 = vadd.f32 %v2113_v27, %v2112_v26  ;;  %v2115_v29 = vpop.f32.mrb[90].mxu0 }
 0x3f4   : > { %v2116_v30 = vpop.f32.mrb[91].mxu0 }
 0x3f5   : > { %v1681_v31 = vadd.f32 %v2114_v28, %v3190_v8  ;;  %v2117_v32 = vadd.f32 %v2116_v30, %v2115_v29 }
 0x3f7   : > { %v1723_v33 = vmax.f32 %v1681_v31, 0.0  ;;  %v1684_v6 = vadd.f32 %v2117_v32, %v3190_v8 }
 0x3f9   : > { %1755 = vst [vmem:[%s3195_s23 + $0xe0] sm:$0xff] %v1723_v33  ;;  %v1724_v7 = vmax.f32 %v1684_v6, 0.0  ;;  %v2118_v37 = vpop.f32.mrb[92].mxu0 }
 0x3fa   : > { %v2119_v14 = vpop.f32.mrb[93].mxu0 }
 0x3fb   : > { %1756 = vst [vmem:[%s3195_s23 + $0xe8] sm:$0xff] %v1724_v7  ;;  %v2120_v44 = vadd.f32 %v2119_v14, %v2118_v37  ;;  %v2121_v48 = vpop.f32.mrb[94].mxu0 }
 0x3fc   : > { %v2122_v17 = vpop.f32.mrb[95].mxu0 }
 0x3fd   : > { %v1689_v20 = vadd.f32 %v2120_v44, %v3190_v8  ;;  %v2123_v49 = vadd.f32 %v2122_v17, %v2121_v48 }
 0x3ff   : > { %v1725_v52 = vmax.f32 %v1689_v20, 0.0  ;;  %v1692_v22 = vadd.f32 %v2123_v49, %v3190_v8 }
 0x401   : > { %1757 = vst [vmem:[%s3195_s23 + $0xf0] sm:$0xff] %v1725_v52  ;;  %v1726_v25 = vmax.f32 %v1692_v22, 0.0 }
 0x403   : > { %1758 = vst [vmem:[%s3195_s23 + $0xf8] sm:$0xff] %v1726_v25 }
 0x404   : > { %2569 = shalt.err (!%p2566_p8)
}
 0x405   : > { %s2570_s1 = scalar_lea.hbm %s3262_s10, 4096  ;;  %s2574_s8 = scalar_lea.hbm %s3317_s7, 8192 }
 0x406   : > { %p2571_p4 = scmp.ne.s32.totalorder %s3262_s10, %s2570_s1  ;;  %p2575_p0 = scmp.lt.u32.totalorder %s3262_s10, %s3317_s7 }
 0x407   : > { %p2576_p5 = scmp.lt.u32.totalorder %s2574_s8, %s2570_s1  ;;  %p2578_p6 = scmp.lt.u32.totalorder %s2570_s1, %s3262_s10 }
 0x408   : > { %p2572_p10 = pnand %p2571_p4, %p3339_p9 }
 0x409   : > { %p2577_p7 = por %p2576_p5, %p2575_p0 }
 0x40a   : > { %p2573_p11 = pneg %p2572_p10 }
 0x40b   : > { %p2579_p12 = por %p2578_p6, %p2577_p7 }
 0x40d   : > { %p2580_p13 = pnand %p2579_p12, %p2573_p11 }
 0x40f   : > { %2583 = shalt.err (!%p2580_p13)
}
 0x410   : > { %s2649_s20 = smov 128   ;;  %s2650_s19 = smov 8  }
 0x411   : > { %2166 = dma.vmem_to_hbm [thread:$0]  (%p3339_p9), %s3264_s21, 4096, %s3262_s10, %s1760_s13, %s2649_s20, %s2649_s20, %s2650_s19  }
 0x412 PF: > { %s1788_s16 = sand.u32 1, %s2622_s24   ;;  %p3340_p1 = scmp.ne.s32.totalorder %s3330_s15, 0 }
 0x413   : > { %p3341_p3 = scmp.ge.s32.totalorder %s2634_s27, 2  ;;  %s1789_s30 = scalar_lea.sflag [#allocation4], %s1788_s16 }
 0x415   : > { %p2192_p2 = pnand %p3341_p3, %p3340_p1 }
 0x417   : > { %2617 = dma.done.wait (!%p2192_p2), %s1789_s30, 4096  }
 0x418   : > { %2619 = vsyncadd (!%p2192_p2), %s1789_s30, 4294963200  ;;  %p23_p8 = scmp.ge.s32.totalorder %s2870_s11, 4   ;;  %s3342_s24 = smov %s2626_s25 }
 0x419   : > { %s3343_s25 = smov %s2630_s26  ;;  %s3344_s26 = smov %s2881_s29 }
 0x41a   : > { %s3345_s27 = smov %s2870_s11  ;;  %25 = sbr.rel (!%p23_p8) target bundleno = 10 (0xa), region = 117 }
 0x421   :  { %1794 = vsyncpa [#allocation3], 1 }
 0x422   :  { %1796 = vsyncpa [#allocation3 + $0x1], 1 }
 0x423   :  { %1797 = vsyncpa [#allocation6], 1 }
 0x424   :  { %1798 = vsyncpa [#allocation9], 1 }
 0x425   :  { %1799 = vsyncpa [#allocation12], 1 }
 0x426   :  { %1800 = vsyncpa [#allocation4], 1 }
 0x427   :  { %1802 = vsyncpa [#allocation4 + $0x1], 1 }

</bundles_post_ra>
